<compile_context>
chip_gen: v6e
topology: v6e:2x2x1
jax: 0.10.0
libtpu: 0.0.40
codegen_flags: <defaults>
</compile_context>

<pallas_src>
import jax
import jax.numpy as jnp
from jax.experimental import pallas as pl
from jax.experimental.pallas import tpu as pltpu

# ----------------------- hyper-parameters (RRNCF.__init__) -------------------
EMBED_DIM = 32                        # embed_dim; must equal mlp_dim for GMF product
MLP_DIM = 32                          # mlp_dim
LSTM_DIM = MLP_DIM                    # lstm_dim
Q_EMBED_DIM = 12
T_EMBED_DIM = EMBED_DIM - Q_EMBED_DIM             # 20
QUESTIONSET_SIZE = 50
TAGSET_SIZE = 30
LSTM_IN = Q_EMBED_DIM + T_EMBED_DIM + 2           # embed_output_dim + 2 = 34
PAD_IN = 40                                       # LSTM input lanes rounded up
F_PACK = PAD_IN + EMBED_DIM                       # 72 packed lanes per row
BN_EPS = 1e-5
B_SUB = 8                                         # f32 sublane tile


# ------------------------------ fused Pallas kernel ---------------------------
def make_fused_kernel(T, B_pad, H):
    """Length-masked LSTM with the MLP/GMF/FC head interleaved per step."""

    def kernel(x_ref, qlen_ref,
               wih_ref, whh_ref, bl_ref,
               w1u_ref, w1qt_ref, b1_ref,
               w2_ref, b2_ref,
               wfg_ref, wfm_ref, bf_ref,
               out_ref):
        x = x_ref[...]                                                     # (N, 72)

        # ---- hoisted: input projection for all T steps (one MXU pass) ----
        # wih rows 34..71 are zero, so the packed GMF lanes do not contribute.
        xg = jnp.dot(x, wih_ref[...],
                     preferred_element_type=jnp.float32) + bl_ref[...]     # (N, 4H)
        # ---- hoisted: uk-independent half of the first MLP layer ----
        head_base = (jnp.dot(x[:, 0:EMBED_DIM], w1qt_ref[...],
                             preferred_element_type=jnp.float32)
                     + b1_ref[...])                                        # (N, MLP)

        whh = whh_ref[...]                                                 # (H, 4H)
        w1u = w1u_ref[...]                                                 # (H, MLP)
        w2 = w2_ref[...]                                                   # (MLP, MLP)
        b2 = b2_ref[...]                                                   # (1, MLP)
        wfg = wfg_ref[...]                                                 # (1, H)
        wfm = wfm_ref[...]                                                 # (1, MLP)
        bf = bf_ref[...]                                                   # (1, 1)
        qlen_bh = jnp.broadcast_to(qlen_ref[...], (B_pad, H))              # hoisted
        lane_t = jax.lax.broadcasted_iota(jnp.int32, (B_pad, T), 1)        # hoisted

        h = jnp.zeros((B_pad, H), jnp.float32)
        c = jnp.zeros((B_pad, H), jnp.float32)
        uk = jnp.zeros((B_pad, H), jnp.float32)        # user_knowledge at time t
        logits = jnp.zeros((B_pad, T), jnp.float32)

        # Fully unrolled (T is a compile-time constant).  Each iteration the
        # head (independent of this step's LSTM update) fills the MXU/VPU/EUP
        # slots that sit idle on the serial h @ W_hh -> gates chain.
        for t in range(T):
            r0 = t * B_pad                              # sublane-aligned (B_pad = 8k)
            x_t = x[r0:r0 + B_pad, :]

            # ---- head for the time-t rows (uk = lstm_out at t-1; zeros at t=0) ----
            h1 = jnp.maximum(
                jnp.dot(uk, w1u, preferred_element_type=jnp.float32)
                + head_base[r0:r0 + B_pad, :], 0.0)
            h2 = jnp.maximum(
                jnp.dot(h1, w2, preferred_element_type=jnp.float32) + b2, 0.0)
            gmf = uk * x_t[:, PAD_IN:PAD_IN + H]        # GMF lanes of the packed stream
            # single fused cross-lane reduce for the final FC
            logit = jnp.sum(gmf * wfg + h2 * wfm, axis=1, keepdims=True) + bf
            logits = jnp.where(lane_t == t, logit, logits)   # lane-select, no store

            # ---- LSTM step t (the only serial chain) ----
            # TODO(synk): on v7x this add could accumulate in the MRB instead of
            #             a pop + VPU add; on v5e/v6e (MRF FIFO) keep this form.
            g = xg[r0:r0 + B_pad, :] + jnp.dot(
                h, whh, preferred_element_type=jnp.float32)                # (B_pad, 4H)
            i_g = jax.nn.sigmoid(g[:, 0:H])             # PyTorch gate order i,f,g,o
            f_g = jax.nn.sigmoid(g[:, H:2 * H])
            g_g = jnp.tanh(g[:, 2 * H:3 * H])
            o_g = jax.nn.sigmoid(g[:, 3 * H:4 * H])
            c_new = f_g * c + i_g * g_g
            h_new = o_g * jnp.tanh(c_new)

            live = qlen_bh > t                          # pure VPU compare
            # pack/pad_packed semantics: padded steps freeze state, emit zeros.
            h = jnp.where(live, h_new, h)
            c = jnp.where(live, c_new, c)
            uk = jnp.where(live, h_new, 0.0)            # roll(+1): uk for time t+1

        out_ref[...] = jax.nn.sigmoid(logits)           # one lane-dense store

    return kernel


# ------------------------------ parameter setup --------------------------------
def init_params(key):
    ks = jax.random.split(key, 12)

    def nrm(k, shape, scale=0.1):
        return scale * jax.random.normal(k, shape, dtype=jnp.float32)

    # Embedding tables (padding_idx rows zeroed).
    q_emb = nrm(ks[0], (QUESTIONSET_SIZE + 1, Q_EMBED_DIM)).at[QUESTIONSET_SIZE].set(0.0)
    t_emb = nrm(ks[1], (TAGSET_SIZE + 1, T_EMBED_DIM)).at[TAGSET_SIZE].set(0.0)
    q_emb_gmf = nrm(ks[2], (QUESTIONSET_SIZE + 1, Q_EMBED_DIM)).at[QUESTIONSET_SIZE].set(0.0)
    t_emb_gmf = nrm(ks[3], (TAGSET_SIZE + 1, T_EMBED_DIM)).at[TAGSET_SIZE].set(0.0)

    # LSTM (stored already transposed for x @ W; b_ih + b_hh folded together).
    w_ih = nrm(ks[4], (LSTM_IN, 4 * LSTM_DIM))
    w_hh = nrm(ks[5], (LSTM_DIM, 4 * LSTM_DIM))
    b_lstm = nrm(ks[6], (1, 4 * LSTM_DIM))

    # MLP
    mlp_in = LSTM_DIM + Q_EMBED_DIM + T_EMBED_DIM   # 64
    w1 = nrm(ks[7], (mlp_in, MLP_DIM))
    b1 = nrm(ks[8], (1, MLP_DIM))
    w2 = nrm(ks[9], (MLP_DIM, MLP_DIM))
    b2 = nrm(ks[10], (1, MLP_DIM))

    # BatchNorm1d params (eval mode uses running stats; these are the init values).
    bn = dict(gamma=jnp.ones((MLP_DIM,), jnp.float32),
              beta=jnp.zeros((MLP_DIM,), jnp.float32),
              mean=jnp.zeros((MLP_DIM,), jnp.float32),
              var=jnp.ones((MLP_DIM,), jnp.float32))

    # Final FC (input order is [gmf, mlp])
    w_fc = nrm(ks[11], (MLP_DIM + LSTM_DIM, 1))
    b_fc = jnp.zeros((1, 1), dtype=jnp.float32)

    return dict(q_emb=q_emb, t_emb=t_emb, q_emb_gmf=q_emb_gmf, t_emb_gmf=t_emb_gmf,
                w_ih=w_ih, w_hh=w_hh, b_lstm=b_lstm,
                w1=w1, b1=b1, bn1=dict(bn), w2=w2, b2=b2, bn2=dict(bn),
                w_fc=w_fc, b_fc=b_fc)


def prepare_params(params):
    """One-time weight prep (out of the per-call path): pad W_ih to the packed
    lane layout, fold BatchNorm(eval) into the Linears, split w1 / w_fc."""
    H = LSTM_DIM

    # W_ih padded to the packed 72-lane layout (rows for pad+GMF lanes are zero).
    w_ih_p = jnp.zeros((F_PACK, 4 * H), jnp.float32).at[:LSTM_IN].set(params["w_ih"])

    def fold_bn(w, b, bn):
        s = bn["gamma"] / jnp.sqrt(bn["var"] + BN_EPS)
        return w * s[None, :], (b - bn["mean"][None, :]) * s[None, :] + bn["beta"][None, :]

    w1f, b1f = fold_bn(params["w1"], params["b1"], params["bn1"])
    w2f, b2f = fold_bn(params["w2"], params["b2"], params["bn2"])
    w1_uk = w1f[:H]                                   # (32, 32) user-knowledge rows
    w1_qt = w1f[H:]                                   # (32, 32) [qs | ts] rows
    wfc_gmf = params["w_fc"][:H, 0][None, :]          # (1, 32)
    wfc_mlp = params["w_fc"][H:, 0][None, :]          # (1, 32)

    return dict(q_emb=params["q_emb"], t_emb=params["t_emb"],
                q_emb_gmf=params["q_emb_gmf"], t_emb_gmf=params["t_emb_gmf"],
                w_ih_p=w_ih_p, w_hh=params["w_hh"], b_lstm=params["b_lstm"],
                w1_uk=w1_uk, w1_qt=w1_qt, b1=b1f, w2=w2f, b2=b2f,
                wfc_gmf=wfc_gmf, wfc_mlp=wfc_mlp, b_fc=params["b_fc"])


# ------------------------------ forward wrapper --------------------------------
def rrncf_forward(prep, questions, timestamps, tags, targets, q_lens):
    """questions:(B,T) int32, timestamps:(B,T) f32, tags:(B,T,K) int32,
    targets:(B,T) f32, q_lens:(B,) int32 with max(q_lens) == T (pad_packed)."""
    B, T = questions.shape
    H = LSTM_DIM
    B_pad = ((B + B_SUB - 1) // B_SUB) * B_SUB        # sublane-aligned batch

    # --- glue: embedding gathers & packed feature assembly (plain JAX) ---
    embed_qs = jnp.take(prep["q_emb"], questions, axis=0)               # (B,T,12)
    embed_ts = jnp.take(prep["t_emb"], tags, axis=0).sum(axis=2)        # (B,T,20)
    embed_qs_g = jnp.take(prep["q_emb_gmf"], questions, axis=0)         # (B,T,12)
    embed_ts_g = jnp.take(prep["t_emb_gmf"], tags, axis=0).sum(axis=2)  # (B,T,20)
    gaps = timestamps[..., None].astype(jnp.float32)                    # (B,T,1)
    tgt = targets[..., None].astype(jnp.float32)                        # (B,T,1)
    zpad = jnp.zeros((B, T, PAD_IN - LSTM_IN), jnp.float32)             # (B,T,6)
    feats = jnp.concatenate(
        [embed_qs, embed_ts, gaps, tgt, zpad, embed_qs_g, embed_ts_g],
        axis=2).astype(jnp.float32)                                     # (B,T,72)

    # pad batch to a sublane multiple, flatten time-major (row = t*B_pad + b)
    feats = jnp.pad(feats, ((0, B_pad - B), (0, 0), (0, 0)))
    x_tm = jnp.transpose(feats, (1, 0, 2)).reshape(T * B_pad, F_PACK)
    qlens2 = jnp.pad(q_lens.astype(jnp.int32), (0, B_pad - B)).reshape(B_pad, 1)

    vm = pl.BlockSpec(memory_space=pltpu.MemorySpace.VMEM)
    kernel = make_fused_kernel(T, B_pad, H)
    # TODO(synk): at these tiny sizes (B*T=16) a single ungridded program is the
    #             right shape; for large B add a batch-parallel grid axis
    #             (dimension_semantics=("parallel",...), v7x: tile under the
    #             64 MiB VMEM / 32 MiB scoped default) and bf16 MXU operands on
    #             v6e/v7x (keep gate/elementwise math f32, esp. on v5e).
    probs = pl.pallas_call(
        kernel,
        out_shape=jax.ShapeDtypeStruct((B_pad, T), jnp.float32),
        in_specs=[vm] * 13,
        out_specs=vm,
    )(x_tm, qlens2,
      prep["w_ih_p"], prep["w_hh"], prep["b_lstm"],
      prep["w1_uk"], prep["w1_qt"], prep["b1"],
      prep["w2"], prep["b2"],
      prep["wfc_gmf"], prep["wfc_mlp"], prep["b_fc"])

    # (B_pad, T) -> PyTorch flat (b*T + t) order; no transpose needed.
    return probs[:B].reshape(-1)                                        # (B*T,)


# ------------------------------------ main --------------------------------------
if __name__ == "__main__":
    key = jax.random.PRNGKey(0)
    pkey, k1, k2, k3, k4 = jax.random.split(key, 5)

    B, T, K = 2, 8, 3
    params = init_params(pkey)
    prep = prepare_params(params)           # one-time weight prep (not per call)

    questions = jax.random.randint(k1, (B, T), 0, QUESTIONSET_SIZE, dtype=jnp.int32)
    timestamps = jax.random.uniform(k2, (B, T), dtype=jnp.float32)
    tags = jax.random.randint(k3, (B, T, K), 0, TAGSET_SIZE, dtype=jnp.int32)
    # mark the last tag slot as padding for some steps
    tags = tags.at[:, :, -1].set(TAGSET_SIZE)
    targets = jax.random.bernoulli(k4, 0.5, (B, T)).astype(jnp.float32)
    q_lens = jnp.array([T, 5], dtype=jnp.int32)   # max length == T (matches pad_packed)

    forward = jax.jit(rrncf_forward)
    out = forward(prep, questions, timestamps, tags, targets, q_lens)
    out = jax.block_until_ready(out)

    assert out.shape == (B * T,)
    assert bool(jnp.all(jnp.isfinite(out)))
    assert bool(jnp.all((out >= 0.0) & (out <= 1.0)))
    print("KERNEL_OK")
</pallas_src>

<mosaic_0001>
module attributes {stable_mosaic.version = 11 : i64} {
  func.func @kernel(%arg0: memref<64x72xf32, #tpu.memory_space<vmem>>, %arg1: memref<8x1xi32, #tpu.memory_space<vmem>>, %arg2: memref<72x128xf32, #tpu.memory_space<vmem>>, %arg3: memref<32x128xf32, #tpu.memory_space<vmem>>, %arg4: memref<1x128xf32, #tpu.memory_space<vmem>>, %arg5: memref<32x32xf32, #tpu.memory_space<vmem>>, %arg6: memref<32x32xf32, #tpu.memory_space<vmem>>, %arg7: memref<1x32xf32, #tpu.memory_space<vmem>>, %arg8: memref<32x32xf32, #tpu.memory_space<vmem>>, %arg9: memref<1x32xf32, #tpu.memory_space<vmem>>, %arg10: memref<1x32xf32, #tpu.memory_space<vmem>>, %arg11: memref<1x32xf32, #tpu.memory_space<vmem>>, %arg12: memref<1x1xf32, #tpu.memory_space<vmem>>, %arg13: memref<8x8xf32, #tpu.memory_space<vmem>>) attributes {dimension_semantics = [], scalar_prefetch = 0 : i64, scratch_operands = 0 : i64, tpu.core_type = #tpu.core_type<tc>} {
    %c0 = arith.constant 0 : index
    %c0_0 = arith.constant 0 : index
    %0 = vector.load %arg0[%c0, %c0_0] : memref<64x72xf32, #tpu.memory_space<vmem>>, vector<64x72xf32>
    %c0_1 = arith.constant 0 : index
    %c0_2 = arith.constant 0 : index
    %1 = vector.load %arg2[%c0_1, %c0_2] : memref<72x128xf32, #tpu.memory_space<vmem>>, vector<72x128xf32>
    %cst = arith.constant dense<0.000000e+00> : vector<64x128xf32>
    %2 = tpu.matmul %0, %1, %cst {dimension_numbers = #tpu.dot_dimension_numbers<[1], [0], [0], [1], [0, 0, 1, 1], [], []>} : vector<64x72xf32>, vector<72x128xf32>, vector<64x128xf32> -> vector<64x128xf32>
    %c0_3 = arith.constant 0 : index
    %c0_4 = arith.constant 0 : index
    %3 = vector.load %arg4[%c0_3, %c0_4] : memref<1x128xf32, #tpu.memory_space<vmem>>, vector<1x128xf32>
    %4 = vector.broadcast %3 : vector<1x128xf32> to vector<64x128xf32>
    %5 = arith.addf %2, %4 : vector<64x128xf32>
    %6 = vector.extract_strided_slice %0 {offsets = [0, 0], sizes = [64, 32], strides = [1, 1]} : vector<64x72xf32> to vector<64x32xf32>
    %c0_5 = arith.constant 0 : index
    %c0_6 = arith.constant 0 : index
    %7 = vector.load %arg6[%c0_5, %c0_6] : memref<32x32xf32, #tpu.memory_space<vmem>>, vector<32x32xf32>
    %cst_7 = arith.constant dense<0.000000e+00> : vector<64x32xf32>
    %8 = tpu.matmul %6, %7, %cst_7 {dimension_numbers = #tpu.dot_dimension_numbers<[1], [0], [0], [1], [0, 0, 1, 1], [], []>} : vector<64x32xf32>, vector<32x32xf32>, vector<64x32xf32> -> vector<64x32xf32>
    %c0_8 = arith.constant 0 : index
    %c0_9 = arith.constant 0 : index
    %9 = vector.load %arg7[%c0_8, %c0_9] : memref<1x32xf32, #tpu.memory_space<vmem>>, vector<1x32xf32>
    %10 = vector.broadcast %9 : vector<1x32xf32> to vector<64x32xf32>
    %11 = arith.addf %8, %10 : vector<64x32xf32>
    %c0_10 = arith.constant 0 : index
    %c0_11 = arith.constant 0 : index
    %12 = vector.load %arg3[%c0_10, %c0_11] : memref<32x128xf32, #tpu.memory_space<vmem>>, vector<32x128xf32>
    %c0_12 = arith.constant 0 : index
    %c0_13 = arith.constant 0 : index
    %13 = vector.load %arg5[%c0_12, %c0_13] : memref<32x32xf32, #tpu.memory_space<vmem>>, vector<32x32xf32>
    %c0_14 = arith.constant 0 : index
    %c0_15 = arith.constant 0 : index
    %14 = vector.load %arg8[%c0_14, %c0_15] : memref<32x32xf32, #tpu.memory_space<vmem>>, vector<32x32xf32>
    %c0_16 = arith.constant 0 : index
    %c0_17 = arith.constant 0 : index
    %15 = vector.load %arg9[%c0_16, %c0_17] : memref<1x32xf32, #tpu.memory_space<vmem>>, vector<1x32xf32>
    %c0_18 = arith.constant 0 : index
    %c0_19 = arith.constant 0 : index
    %16 = vector.load %arg10[%c0_18, %c0_19] : memref<1x32xf32, #tpu.memory_space<vmem>>, vector<1x32xf32>
    %c0_20 = arith.constant 0 : index
    %c0_21 = arith.constant 0 : index
    %17 = vector.load %arg11[%c0_20, %c0_21] : memref<1x32xf32, #tpu.memory_space<vmem>>, vector<1x32xf32>
    %c0_22 = arith.constant 0 : index
    %c0_23 = arith.constant 0 : index
    %18 = vector.load %arg12[%c0_22, %c0_23] : memref<1x1xf32, #tpu.memory_space<vmem>>, vector<1x1xf32>
    %c0_24 = arith.constant 0 : index
    %c0_25 = arith.constant 0 : index
    %19 = vector.load %arg1[%c0_24, %c0_25] : memref<8x1xi32, #tpu.memory_space<vmem>>, vector<8x1xi32>
    %20 = vector.shape_cast %19 : vector<8x1xi32> to vector<8x1xi32>
    %21 = vector.broadcast %20 : vector<8x1xi32> to vector<8x32xi32>
    %22 = tpu.iota {dimensions = array<i32: 1>} : vector<8x8xi32>
    %cst_26 = arith.constant 0.000000e+00 : f32
    %23 = vector.broadcast %cst_26 : f32 to vector<8x32xf32>
    %cst_27 = arith.constant 0.000000e+00 : f32
    %24 = vector.broadcast %cst_27 : f32 to vector<8x32xf32>
    %cst_28 = arith.constant 0.000000e+00 : f32
    %25 = vector.broadcast %cst_28 : f32 to vector<8x32xf32>
    %cst_29 = arith.constant 0.000000e+00 : f32
    %26 = vector.broadcast %cst_29 : f32 to vector<8x8xf32>
    %27 = vector.extract_strided_slice %0 {offsets = [0, 0], sizes = [8, 72], strides = [1, 1]} : vector<64x72xf32> to vector<8x72xf32>
    %cst_30 = arith.constant dense<0.000000e+00> : vector<8x32xf32>
    %28 = tpu.matmul %25, %13, %cst_30 {dimension_numbers = #tpu.dot_dimension_numbers<[1], [0], [0], [1], [0, 0, 1, 1], [], []>} : vector<8x32xf32>, vector<32x32xf32>, vector<8x32xf32> -> vector<8x32xf32>
    %29 = vector.extract_strided_slice %11 {offsets = [0, 0], sizes = [8, 32], strides = [1, 1]} : vector<64x32xf32> to vector<8x32xf32>
    %30 = arith.addf %28, %29 : vector<8x32xf32>
    %cst_31 = arith.constant 0.000000e+00 : f32
    %31 = vector.broadcast %cst_31 : f32 to vector<8x32xf32>
    %32 = arith.maximumf %30, %31 : vector<8x32xf32>
    %cst_32 = arith.constant dense<0.000000e+00> : vector<8x32xf32>
    %33 = tpu.matmul %32, %14, %cst_32 {dimension_numbers = #tpu.dot_dimension_numbers<[1], [0], [0], [1], [0, 0, 1, 1], [], []>} : vector<8x32xf32>, vector<32x32xf32>, vector<8x32xf32> -> vector<8x32xf32>
    %34 = vector.broadcast %15 : vector<1x32xf32> to vector<8x32xf32>
    %35 = arith.addf %33, %34 : vector<8x32xf32>
    %cst_33 = arith.constant 0.000000e+00 : f32
    %36 = vector.broadcast %cst_33 : f32 to vector<8x32xf32>
    %37 = arith.maximumf %35, %36 : vector<8x32xf32>
    %38 = vector.extract_strided_slice %27 {offsets = [0, 40], sizes = [8, 32], strides = [1, 1]} : vector<8x72xf32> to vector<8x32xf32>
    %39 = arith.mulf %25, %38 : vector<8x32xf32>
    %40 = vector.broadcast %16 : vector<1x32xf32> to vector<8x32xf32>
    %41 = arith.mulf %39, %40 : vector<8x32xf32>
    %42 = vector.broadcast %17 : vector<1x32xf32> to vector<8x32xf32>
    %43 = arith.mulf %37, %42 : vector<8x32xf32>
    %44 = arith.addf %41, %43 : vector<8x32xf32>
    %cst_34 = arith.constant dense<0.000000e+00> : vector<8xf32>
    %45 = vector.multi_reduction <add>, %44, %cst_34 [1] : vector<8x32xf32> to vector<8xf32>
    %46 = vector.shape_cast %45 : vector<8xf32> to vector<8x1xf32>
    %47 = vector.broadcast %18 : vector<1x1xf32> to vector<8x1xf32>
    %48 = arith.addf %46, %47 : vector<8x1xf32>
    %c0_i32 = arith.constant 0 : i32
    %49 = vector.broadcast %c0_i32 : i32 to vector<8x8xi32>
    %50 = arith.cmpi eq, %22, %49 : vector<8x8xi32>
    %51 = vector.shape_cast %48 : vector<8x1xf32> to vector<8x1xf32>
    %52 = vector.broadcast %51 : vector<8x1xf32> to vector<8x8xf32>
    %53 = arith.select %50, %52, %26 : vector<8x8xi1>, vector<8x8xf32>
    %54 = vector.extract_strided_slice %5 {offsets = [0, 0], sizes = [8, 128], strides = [1, 1]} : vector<64x128xf32> to vector<8x128xf32>
    %cst_35 = arith.constant dense<0.000000e+00> : vector<8x128xf32>
    %55 = tpu.matmul %23, %12, %cst_35 {dimension_numbers = #tpu.dot_dimension_numbers<[1], [0], [0], [1], [0, 0, 1, 1], [], []>} : vector<8x32xf32>, vector<32x128xf32>, vector<8x128xf32> -> vector<8x128xf32>
    %56 = arith.addf %54, %55 : vector<8x128xf32>
    %57 = vector.extract_strided_slice %56 {offsets = [0, 0], sizes = [8, 32], strides = [1, 1]} : vector<8x128xf32> to vector<8x32xf32>
    %58 = arith.negf %57 : vector<8x32xf32>
    %59 = math.exp %58 : vector<8x32xf32>
    %cst_36 = arith.constant 1.000000e+00 : f32
    %60 = vector.broadcast %cst_36 : f32 to vector<8x32xf32>
    %61 = arith.addf %60, %59 : vector<8x32xf32>
    %62 = arith.divf %60, %61 : vector<8x32xf32>
    %63 = vector.extract_strided_slice %56 {offsets = [0, 32], sizes = [8, 32], strides = [1, 1]} : vector<8x128xf32> to vector<8x32xf32>
    %64 = arith.negf %63 : vector<8x32xf32>
    %65 = math.exp %64 : vector<8x32xf32>
    %cst_37 = arith.constant 1.000000e+00 : f32
    %66 = vector.broadcast %cst_37 : f32 to vector<8x32xf32>
    %67 = arith.addf %66, %65 : vector<8x32xf32>
    %68 = arith.divf %66, %67 : vector<8x32xf32>
    %69 = vector.extract_strided_slice %56 {offsets = [0, 64], sizes = [8, 32], strides = [1, 1]} : vector<8x128xf32> to vector<8x32xf32>
    %70 = math.tanh %69 : vector<8x32xf32>
    %71 = vector.extract_strided_slice %56 {offsets = [0, 96], sizes = [8, 32], strides = [1, 1]} : vector<8x128xf32> to vector<8x32xf32>
    %72 = arith.negf %71 : vector<8x32xf32>
    %73 = math.exp %72 : vector<8x32xf32>
    %cst_38 = arith.constant 1.000000e+00 : f32
    %74 = vector.broadcast %cst_38 : f32 to vector<8x32xf32>
    %75 = arith.addf %74, %73 : vector<8x32xf32>
    %76 = arith.divf %74, %75 : vector<8x32xf32>
    %77 = arith.mulf %68, %24 : vector<8x32xf32>
    %78 = arith.mulf %62, %70 : vector<8x32xf32>
    %79 = arith.addf %77, %78 : vector<8x32xf32>
    %80 = math.tanh %79 : vector<8x32xf32>
    %81 = arith.mulf %76, %80 : vector<8x32xf32>
    %c0_i32_39 = arith.constant 0 : i32
    %82 = vector.broadcast %c0_i32_39 : i32 to vector<8x32xi32>
    %83 = arith.cmpi sgt, %21, %82 : vector<8x32xi32>
    %84 = arith.select %83, %81, %23 : vector<8x32xi1>, vector<8x32xf32>
    %85 = arith.select %83, %79, %24 : vector<8x32xi1>, vector<8x32xf32>
    %cst_40 = arith.constant 0.000000e+00 : f32
    %86 = vector.broadcast %cst_40 : f32 to vector<8x32xf32>
    %87 = arith.select %83, %81, %86 : vector<8x32xi1>, vector<8x32xf32>
    %88 = vector.extract_strided_slice %0 {offsets = [8, 0], sizes = [8, 72], strides = [1, 1]} : vector<64x72xf32> to vector<8x72xf32>
    %cst_41 = arith.constant dense<0.000000e+00> : vector<8x32xf32>
    %89 = tpu.matmul %87, %13, %cst_41 {dimension_numbers = #tpu.dot_dimension_numbers<[1], [0], [0], [1], [0, 0, 1, 1], [], []>} : vector<8x32xf32>, vector<32x32xf32>, vector<8x32xf32> -> vector<8x32xf32>
    %90 = vector.extract_strided_slice %11 {offsets = [8, 0], sizes = [8, 32], strides = [1, 1]} : vector<64x32xf32> to vector<8x32xf32>
    %91 = arith.addf %89, %90 : vector<8x32xf32>
    %cst_42 = arith.constant 0.000000e+00 : f32
    %92 = vector.broadcast %cst_42 : f32 to vector<8x32xf32>
    %93 = arith.maximumf %91, %92 : vector<8x32xf32>
    %cst_43 = arith.constant dense<0.000000e+00> : vector<8x32xf32>
    %94 = tpu.matmul %93, %14, %cst_43 {dimension_numbers = #tpu.dot_dimension_numbers<[1], [0], [0], [1], [0, 0, 1, 1], [], []>} : vector<8x32xf32>, vector<32x32xf32>, vector<8x32xf32> -> vector<8x32xf32>
    %95 = vector.broadcast %15 : vector<1x32xf32> to vector<8x32xf32>
    %96 = arith.addf %94, %95 : vector<8x32xf32>
    %cst_44 = arith.constant 0.000000e+00 : f32
    %97 = vector.broadcast %cst_44 : f32 to vector<8x32xf32>
    %98 = arith.maximumf %96, %97 : vector<8x32xf32>
    %99 = vector.extract_strided_slice %88 {offsets = [0, 40], sizes = [8, 32], strides = [1, 1]} : vector<8x72xf32> to vector<8x32xf32>
    %100 = arith.mulf %87, %99 : vector<8x32xf32>
    %101 = vector.broadcast %16 : vector<1x32xf32> to vector<8x32xf32>
    %102 = arith.mulf %100, %101 : vector<8x32xf32>
    %103 = vector.broadcast %17 : vector<1x32xf32> to vector<8x32xf32>
    %104 = arith.mulf %98, %103 : vector<8x32xf32>
    %105 = arith.addf %102, %104 : vector<8x32xf32>
    %cst_45 = arith.constant dense<0.000000e+00> : vector<8xf32>
    %106 = vector.multi_reduction <add>, %105, %cst_45 [1] : vector<8x32xf32> to vector<8xf32>
    %107 = vector.shape_cast %106 : vector<8xf32> to vector<8x1xf32>
    %108 = vector.broadcast %18 : vector<1x1xf32> to vector<8x1xf32>
    %109 = arith.addf %107, %108 : vector<8x1xf32>
    %c1_i32 = arith.constant 1 : i32
    %110 = vector.broadcast %c1_i32 : i32 to vector<8x8xi32>
    %111 = arith.cmpi eq, %22, %110 : vector<8x8xi32>
    %112 = vector.shape_cast %109 : vector<8x1xf32> to vector<8x1xf32>
    %113 = vector.broadcast %112 : vector<8x1xf32> to vector<8x8xf32>
    %114 = arith.select %111, %113, %53 : vector<8x8xi1>, vector<8x8xf32>
    %115 = vector.extract_strided_slice %5 {offsets = [8, 0], sizes = [8, 128], strides = [1, 1]} : vector<64x128xf32> to vector<8x128xf32>
    %cst_46 = arith.constant dense<0.000000e+00> : vector<8x128xf32>
    %116 = tpu.matmul %84, %12, %cst_46 {dimension_numbers = #tpu.dot_dimension_numbers<[1], [0], [0], [1], [0, 0, 1, 1], [], []>} : vector<8x32xf32>, vector<32x128xf32>, vector<8x128xf32> -> vector<8x128xf32>
    %117 = arith.addf %115, %116 : vector<8x128xf32>
    %118 = vector.extract_strided_slice %117 {offsets = [0, 0], sizes = [8, 32], strides = [1, 1]} : vector<8x128xf32> to vector<8x32xf32>
    %119 = arith.negf %118 : vector<8x32xf32>
    %120 = math.exp %119 : vector<8x32xf32>
    %cst_47 = arith.constant 1.000000e+00 : f32
    %121 = vector.broadcast %cst_47 : f32 to vector<8x32xf32>
    %122 = arith.addf %121, %120 : vector<8x32xf32>
    %123 = arith.divf %121, %122 : vector<8x32xf32>
    %124 = vector.extract_strided_slice %117 {offsets = [0, 32], sizes = [8, 32], strides = [1, 1]} : vector<8x128xf32> to vector<8x32xf32>
    %125 = arith.negf %124 : vector<8x32xf32>
    %126 = math.exp %125 : vector<8x32xf32>
    %cst_48 = arith.constant 1.000000e+00 : f32
    %127 = vector.broadcast %cst_48 : f32 to vector<8x32xf32>
    %128 = arith.addf %127, %126 : vector<8x32xf32>
    %129 = arith.divf %127, %128 : vector<8x32xf32>
    %130 = vector.extract_strided_slice %117 {offsets = [0, 64], sizes = [8, 32], strides = [1, 1]} : vector<8x128xf32> to vector<8x32xf32>
    %131 = math.tanh %130 : vector<8x32xf32>
    %132 = vector.extract_strided_slice %117 {offsets = [0, 96], sizes = [8, 32], strides = [1, 1]} : vector<8x128xf32> to vector<8x32xf32>
    %133 = arith.negf %132 : vector<8x32xf32>
    %134 = math.exp %133 : vector<8x32xf32>
    %cst_49 = arith.constant 1.000000e+00 : f32
    %135 = vector.broadcast %cst_49 : f32 to vector<8x32xf32>
    %136 = arith.addf %135, %134 : vector<8x32xf32>
    %137 = arith.divf %135, %136 : vector<8x32xf32>
    %138 = arith.mulf %129, %85 : vector<8x32xf32>
    %139 = arith.mulf %123, %131 : vector<8x32xf32>
    %140 = arith.addf %138, %139 : vector<8x32xf32>
    %141 = math.tanh %140 : vector<8x32xf32>
    %142 = arith.mulf %137, %141 : vector<8x32xf32>
    %c1_i32_50 = arith.constant 1 : i32
    %143 = vector.broadcast %c1_i32_50 : i32 to vector<8x32xi32>
    %144 = arith.cmpi sgt, %21, %143 : vector<8x32xi32>
    %145 = arith.select %144, %142, %84 : vector<8x32xi1>, vector<8x32xf32>
    %146 = arith.select %144, %140, %85 : vector<8x32xi1>, vector<8x32xf32>
    %cst_51 = arith.constant 0.000000e+00 : f32
    %147 = vector.broadcast %cst_51 : f32 to vector<8x32xf32>
    %148 = arith.select %144, %142, %147 : vector<8x32xi1>, vector<8x32xf32>
    %149 = vector.extract_strided_slice %0 {offsets = [16, 0], sizes = [8, 72], strides = [1, 1]} : vector<64x72xf32> to vector<8x72xf32>
    %cst_52 = arith.constant dense<0.000000e+00> : vector<8x32xf32>
    %150 = tpu.matmul %148, %13, %cst_52 {dimension_numbers = #tpu.dot_dimension_numbers<[1], [0], [0], [1], [0, 0, 1, 1], [], []>} : vector<8x32xf32>, vector<32x32xf32>, vector<8x32xf32> -> vector<8x32xf32>
    %151 = vector.extract_strided_slice %11 {offsets = [16, 0], sizes = [8, 32], strides = [1, 1]} : vector<64x32xf32> to vector<8x32xf32>
    %152 = arith.addf %150, %151 : vector<8x32xf32>
    %cst_53 = arith.constant 0.000000e+00 : f32
    %153 = vector.broadcast %cst_53 : f32 to vector<8x32xf32>
    %154 = arith.maximumf %152, %153 : vector<8x32xf32>
    %cst_54 = arith.constant dense<0.000000e+00> : vector<8x32xf32>
    %155 = tpu.matmul %154, %14, %cst_54 {dimension_numbers = #tpu.dot_dimension_numbers<[1], [0], [0], [1], [0, 0, 1, 1], [], []>} : vector<8x32xf32>, vector<32x32xf32>, vector<8x32xf32> -> vector<8x32xf32>
    %156 = vector.broadcast %15 : vector<1x32xf32> to vector<8x32xf32>
    %157 = arith.addf %155, %156 : vector<8x32xf32>
    %cst_55 = arith.constant 0.000000e+00 : f32
    %158 = vector.broadcast %cst_55 : f32 to vector<8x32xf32>
    %159 = arith.maximumf %157, %158 : vector<8x32xf32>
    %160 = vector.extract_strided_slice %149 {offsets = [0, 40], sizes = [8, 32], strides = [1, 1]} : vector<8x72xf32> to vector<8x32xf32>
    %161 = arith.mulf %148, %160 : vector<8x32xf32>
    %162 = vector.broadcast %16 : vector<1x32xf32> to vector<8x32xf32>
    %163 = arith.mulf %161, %162 : vector<8x32xf32>
    %164 = vector.broadcast %17 : vector<1x32xf32> to vector<8x32xf32>
    %165 = arith.mulf %159, %164 : vector<8x32xf32>
    %166 = arith.addf %163, %165 : vector<8x32xf32>
    %cst_56 = arith.constant dense<0.000000e+00> : vector<8xf32>
    %167 = vector.multi_reduction <add>, %166, %cst_56 [1] : vector<8x32xf32> to vector<8xf32>
    %168 = vector.shape_cast %167 : vector<8xf32> to vector<8x1xf32>
    %169 = vector.broadcast %18 : vector<1x1xf32> to vector<8x1xf32>
    %170 = arith.addf %168, %169 : vector<8x1xf32>
    %c2_i32 = arith.constant 2 : i32
    %171 = vector.broadcast %c2_i32 : i32 to vector<8x8xi32>
    %172 = arith.cmpi eq, %22, %171 : vector<8x8xi32>
    %173 = vector.shape_cast %170 : vector<8x1xf32> to vector<8x1xf32>
    %174 = vector.broadcast %173 : vector<8x1xf32> to vector<8x8xf32>
    %175 = arith.select %172, %174, %114 : vector<8x8xi1>, vector<8x8xf32>
    %176 = vector.extract_strided_slice %5 {offsets = [16, 0], sizes = [8, 128], strides = [1, 1]} : vector<64x128xf32> to vector<8x128xf32>
    %cst_57 = arith.constant dense<0.000000e+00> : vector<8x128xf32>
    %177 = tpu.matmul %145, %12, %cst_57 {dimension_numbers = #tpu.dot_dimension_numbers<[1], [0], [0], [1], [0, 0, 1, 1], [], []>} : vector<8x32xf32>, vector<32x128xf32>, vector<8x128xf32> -> vector<8x128xf32>
    %178 = arith.addf %176, %177 : vector<8x128xf32>
    %179 = vector.extract_strided_slice %178 {offsets = [0, 0], sizes = [8, 32], strides = [1, 1]} : vector<8x128xf32> to vector<8x32xf32>
    %180 = arith.negf %179 : vector<8x32xf32>
    %181 = math.exp %180 : vector<8x32xf32>
    %cst_58 = arith.constant 1.000000e+00 : f32
    %182 = vector.broadcast %cst_58 : f32 to vector<8x32xf32>
    %183 = arith.addf %182, %181 : vector<8x32xf32>
    %184 = arith.divf %182, %183 : vector<8x32xf32>
    %185 = vector.extract_strided_slice %178 {offsets = [0, 32], sizes = [8, 32], strides = [1, 1]} : vector<8x128xf32> to vector<8x32xf32>
    %186 = arith.negf %185 : vector<8x32xf32>
    %187 = math.exp %186 : vector<8x32xf32>
    %cst_59 = arith.constant 1.000000e+00 : f32
    %188 = vector.broadcast %cst_59 : f32 to vector<8x32xf32>
    %189 = arith.addf %188, %187 : vector<8x32xf32>
    %190 = arith.divf %188, %189 : vector<8x32xf32>
    %191 = vector.extract_strided_slice %178 {offsets = [0, 64], sizes = [8, 32], strides = [1, 1]} : vector<8x128xf32> to vector<8x32xf32>
    %192 = math.tanh %191 : vector<8x32xf32>
    %193 = vector.extract_strided_slice %178 {offsets = [0, 96], sizes = [8, 32], strides = [1, 1]} : vector<8x128xf32> to vector<8x32xf32>
    %194 = arith.negf %193 : vector<8x32xf32>
    %195 = math.exp %194 : vector<8x32xf32>
    %cst_60 = arith.constant 1.000000e+00 : f32
    %196 = vector.broadcast %cst_60 : f32 to vector<8x32xf32>
    %197 = arith.addf %196, %195 : vector<8x32xf32>
    %198 = arith.divf %196, %197 : vector<8x32xf32>
    %199 = arith.mulf %190, %146 : vector<8x32xf32>
    %200 = arith.mulf %184, %192 : vector<8x32xf32>
    %201 = arith.addf %199, %200 : vector<8x32xf32>
    %202 = math.tanh %201 : vector<8x32xf32>
    %203 = arith.mulf %198, %202 : vector<8x32xf32>
    %c2_i32_61 = arith.constant 2 : i32
    %204 = vector.broadcast %c2_i32_61 : i32 to vector<8x32xi32>
    %205 = arith.cmpi sgt, %21, %204 : vector<8x32xi32>
    %206 = arith.select %205, %203, %145 : vector<8x32xi1>, vector<8x32xf32>
    %207 = arith.select %205, %201, %146 : vector<8x32xi1>, vector<8x32xf32>
    %cst_62 = arith.constant 0.000000e+00 : f32
    %208 = vector.broadcast %cst_62 : f32 to vector<8x32xf32>
    %209 = arith.select %205, %203, %208 : vector<8x32xi1>, vector<8x32xf32>
    %210 = vector.extract_strided_slice %0 {offsets = [24, 0], sizes = [8, 72], strides = [1, 1]} : vector<64x72xf32> to vector<8x72xf32>
    %cst_63 = arith.constant dense<0.000000e+00> : vector<8x32xf32>
    %211 = tpu.matmul %209, %13, %cst_63 {dimension_numbers = #tpu.dot_dimension_numbers<[1], [0], [0], [1], [0, 0, 1, 1], [], []>} : vector<8x32xf32>, vector<32x32xf32>, vector<8x32xf32> -> vector<8x32xf32>
    %212 = vector.extract_strided_slice %11 {offsets = [24, 0], sizes = [8, 32], strides = [1, 1]} : vector<64x32xf32> to vector<8x32xf32>
    %213 = arith.addf %211, %212 : vector<8x32xf32>
    %cst_64 = arith.constant 0.000000e+00 : f32
    %214 = vector.broadcast %cst_64 : f32 to vector<8x32xf32>
    %215 = arith.maximumf %213, %214 : vector<8x32xf32>
    %cst_65 = arith.constant dense<0.000000e+00> : vector<8x32xf32>
    %216 = tpu.matmul %215, %14, %cst_65 {dimension_numbers = #tpu.dot_dimension_numbers<[1], [0], [0], [1], [0, 0, 1, 1], [], []>} : vector<8x32xf32>, vector<32x32xf32>, vector<8x32xf32> -> vector<8x32xf32>
    %217 = vector.broadcast %15 : vector<1x32xf32> to vector<8x32xf32>
    %218 = arith.addf %216, %217 : vector<8x32xf32>
    %cst_66 = arith.constant 0.000000e+00 : f32
    %219 = vector.broadcast %cst_66 : f32 to vector<8x32xf32>
    %220 = arith.maximumf %218, %219 : vector<8x32xf32>
    %221 = vector.extract_strided_slice %210 {offsets = [0, 40], sizes = [8, 32], strides = [1, 1]} : vector<8x72xf32> to vector<8x32xf32>
    %222 = arith.mulf %209, %221 : vector<8x32xf32>
    %223 = vector.broadcast %16 : vector<1x32xf32> to vector<8x32xf32>
    %224 = arith.mulf %222, %223 : vector<8x32xf32>
    %225 = vector.broadcast %17 : vector<1x32xf32> to vector<8x32xf32>
    %226 = arith.mulf %220, %225 : vector<8x32xf32>
    %227 = arith.addf %224, %226 : vector<8x32xf32>
    %cst_67 = arith.constant dense<0.000000e+00> : vector<8xf32>
    %228 = vector.multi_reduction <add>, %227, %cst_67 [1] : vector<8x32xf32> to vector<8xf32>
    %229 = vector.shape_cast %228 : vector<8xf32> to vector<8x1xf32>
    %230 = vector.broadcast %18 : vector<1x1xf32> to vector<8x1xf32>
    %231 = arith.addf %229, %230 : vector<8x1xf32>
    %c3_i32 = arith.constant 3 : i32
    %232 = vector.broadcast %c3_i32 : i32 to vector<8x8xi32>
    %233 = arith.cmpi eq, %22, %232 : vector<8x8xi32>
    %234 = vector.shape_cast %231 : vector<8x1xf32> to vector<8x1xf32>
    %235 = vector.broadcast %234 : vector<8x1xf32> to vector<8x8xf32>
    %236 = arith.select %233, %235, %175 : vector<8x8xi1>, vector<8x8xf32>
    %237 = vector.extract_strided_slice %5 {offsets = [24, 0], sizes = [8, 128], strides = [1, 1]} : vector<64x128xf32> to vector<8x128xf32>
    %cst_68 = arith.constant dense<0.000000e+00> : vector<8x128xf32>
    %238 = tpu.matmul %206, %12, %cst_68 {dimension_numbers = #tpu.dot_dimension_numbers<[1], [0], [0], [1], [0, 0, 1, 1], [], []>} : vector<8x32xf32>, vector<32x128xf32>, vector<8x128xf32> -> vector<8x128xf32>
    %239 = arith.addf %237, %238 : vector<8x128xf32>
    %240 = vector.extract_strided_slice %239 {offsets = [0, 0], sizes = [8, 32], strides = [1, 1]} : vector<8x128xf32> to vector<8x32xf32>
    %241 = arith.negf %240 : vector<8x32xf32>
    %242 = math.exp %241 : vector<8x32xf32>
    %cst_69 = arith.constant 1.000000e+00 : f32
    %243 = vector.broadcast %cst_69 : f32 to vector<8x32xf32>
    %244 = arith.addf %243, %242 : vector<8x32xf32>
    %245 = arith.divf %243, %244 : vector<8x32xf32>
    %246 = vector.extract_strided_slice %239 {offsets = [0, 32], sizes = [8, 32], strides = [1, 1]} : vector<8x128xf32> to vector<8x32xf32>
    %247 = arith.negf %246 : vector<8x32xf32>
    %248 = math.exp %247 : vector<8x32xf32>
    %cst_70 = arith.constant 1.000000e+00 : f32
    %249 = vector.broadcast %cst_70 : f32 to vector<8x32xf32>
    %250 = arith.addf %249, %248 : vector<8x32xf32>
    %251 = arith.divf %249, %250 : vector<8x32xf32>
    %252 = vector.extract_strided_slice %239 {offsets = [0, 64], sizes = [8, 32], strides = [1, 1]} : vector<8x128xf32> to vector<8x32xf32>
    %253 = math.tanh %252 : vector<8x32xf32>
    %254 = vector.extract_strided_slice %239 {offsets = [0, 96], sizes = [8, 32], strides = [1, 1]} : vector<8x128xf32> to vector<8x32xf32>
    %255 = arith.negf %254 : vector<8x32xf32>
    %256 = math.exp %255 : vector<8x32xf32>
    %cst_71 = arith.constant 1.000000e+00 : f32
    %257 = vector.broadcast %cst_71 : f32 to vector<8x32xf32>
    %258 = arith.addf %257, %256 : vector<8x32xf32>
    %259 = arith.divf %257, %258 : vector<8x32xf32>
    %260 = arith.mulf %251, %207 : vector<8x32xf32>
    %261 = arith.mulf %245, %253 : vector<8x32xf32>
    %262 = arith.addf %260, %261 : vector<8x32xf32>
    %263 = math.tanh %262 : vector<8x32xf32>
    %264 = arith.mulf %259, %263 : vector<8x32xf32>
    %c3_i32_72 = arith.constant 3 : i32
    %265 = vector.broadcast %c3_i32_72 : i32 to vector<8x32xi32>
    %266 = arith.cmpi sgt, %21, %265 : vector<8x32xi32>
    %267 = arith.select %266, %264, %206 : vector<8x32xi1>, vector<8x32xf32>
    %268 = arith.select %266, %262, %207 : vector<8x32xi1>, vector<8x32xf32>
    %cst_73 = arith.constant 0.000000e+00 : f32
    %269 = vector.broadcast %cst_73 : f32 to vector<8x32xf32>
    %270 = arith.select %266, %264, %269 : vector<8x32xi1>, vector<8x32xf32>
    %271 = vector.extract_strided_slice %0 {offsets = [32, 0], sizes = [8, 72], strides = [1, 1]} : vector<64x72xf32> to vector<8x72xf32>
    %cst_74 = arith.constant dense<0.000000e+00> : vector<8x32xf32>
    %272 = tpu.matmul %270, %13, %cst_74 {dimension_numbers = #tpu.dot_dimension_numbers<[1], [0], [0], [1], [0, 0, 1, 1], [], []>} : vector<8x32xf32>, vector<32x32xf32>, vector<8x32xf32> -> vector<8x32xf32>
    %273 = vector.extract_strided_slice %11 {offsets = [32, 0], sizes = [8, 32], strides = [1, 1]} : vector<64x32xf32> to vector<8x32xf32>
    %274 = arith.addf %272, %273 : vector<8x32xf32>
    %cst_75 = arith.constant 0.000000e+00 : f32
    %275 = vector.broadcast %cst_75 : f32 to vector<8x32xf32>
    %276 = arith.maximumf %274, %275 : vector<8x32xf32>
    %cst_76 = arith.constant dense<0.000000e+00> : vector<8x32xf32>
    %277 = tpu.matmul %276, %14, %cst_76 {dimension_numbers = #tpu.dot_dimension_numbers<[1], [0], [0], [1], [0, 0, 1, 1], [], []>} : vector<8x32xf32>, vector<32x32xf32>, vector<8x32xf32> -> vector<8x32xf32>
    %278 = vector.broadcast %15 : vector<1x32xf32> to vector<8x32xf32>
    %279 = arith.addf %277, %278 : vector<8x32xf32>
    %cst_77 = arith.constant 0.000000e+00 : f32
    %280 = vector.broadcast %cst_77 : f32 to vector<8x32xf32>
    %281 = arith.maximumf %279, %280 : vector<8x32xf32>
    %282 = vector.extract_strided_slice %271 {offsets = [0, 40], sizes = [8, 32], strides = [1, 1]} : vector<8x72xf32> to vector<8x32xf32>
    %283 = arith.mulf %270, %282 : vector<8x32xf32>
    %284 = vector.broadcast %16 : vector<1x32xf32> to vector<8x32xf32>
    %285 = arith.mulf %283, %284 : vector<8x32xf32>
    %286 = vector.broadcast %17 : vector<1x32xf32> to vector<8x32xf32>
    %287 = arith.mulf %281, %286 : vector<8x32xf32>
    %288 = arith.addf %285, %287 : vector<8x32xf32>
    %cst_78 = arith.constant dense<0.000000e+00> : vector<8xf32>
    %289 = vector.multi_reduction <add>, %288, %cst_78 [1] : vector<8x32xf32> to vector<8xf32>
    %290 = vector.shape_cast %289 : vector<8xf32> to vector<8x1xf32>
    %291 = vector.broadcast %18 : vector<1x1xf32> to vector<8x1xf32>
    %292 = arith.addf %290, %291 : vector<8x1xf32>
    %c4_i32 = arith.constant 4 : i32
    %293 = vector.broadcast %c4_i32 : i32 to vector<8x8xi32>
    %294 = arith.cmpi eq, %22, %293 : vector<8x8xi32>
    %295 = vector.shape_cast %292 : vector<8x1xf32> to vector<8x1xf32>
    %296 = vector.broadcast %295 : vector<8x1xf32> to vector<8x8xf32>
    %297 = arith.select %294, %296, %236 : vector<8x8xi1>, vector<8x8xf32>
    %298 = vector.extract_strided_slice %5 {offsets = [32, 0], sizes = [8, 128], strides = [1, 1]} : vector<64x128xf32> to vector<8x128xf32>
    %cst_79 = arith.constant dense<0.000000e+00> : vector<8x128xf32>
    %299 = tpu.matmul %267, %12, %cst_79 {dimension_numbers = #tpu.dot_dimension_numbers<[1], [0], [0], [1], [0, 0, 1, 1], [], []>} : vector<8x32xf32>, vector<32x128xf32>, vector<8x128xf32> -> vector<8x128xf32>
    %300 = arith.addf %298, %299 : vector<8x128xf32>
    %301 = vector.extract_strided_slice %300 {offsets = [0, 0], sizes = [8, 32], strides = [1, 1]} : vector<8x128xf32> to vector<8x32xf32>
    %302 = arith.negf %301 : vector<8x32xf32>
    %303 = math.exp %302 : vector<8x32xf32>
    %cst_80 = arith.constant 1.000000e+00 : f32
    %304 = vector.broadcast %cst_80 : f32 to vector<8x32xf32>
    %305 = arith.addf %304, %303 : vector<8x32xf32>
    %306 = arith.divf %304, %305 : vector<8x32xf32>
    %307 = vector.extract_strided_slice %300 {offsets = [0, 32], sizes = [8, 32], strides = [1, 1]} : vector<8x128xf32> to vector<8x32xf32>
    %308 = arith.negf %307 : vector<8x32xf32>
    %309 = math.exp %308 : vector<8x32xf32>
    %cst_81 = arith.constant 1.000000e+00 : f32
    %310 = vector.broadcast %cst_81 : f32 to vector<8x32xf32>
    %311 = arith.addf %310, %309 : vector<8x32xf32>
    %312 = arith.divf %310, %311 : vector<8x32xf32>
    %313 = vector.extract_strided_slice %300 {offsets = [0, 64], sizes = [8, 32], strides = [1, 1]} : vector<8x128xf32> to vector<8x32xf32>
    %314 = math.tanh %313 : vector<8x32xf32>
    %315 = vector.extract_strided_slice %300 {offsets = [0, 96], sizes = [8, 32], strides = [1, 1]} : vector<8x128xf32> to vector<8x32xf32>
    %316 = arith.negf %315 : vector<8x32xf32>
    %317 = math.exp %316 : vector<8x32xf32>
    %cst_82 = arith.constant 1.000000e+00 : f32
    %318 = vector.broadcast %cst_82 : f32 to vector<8x32xf32>
    %319 = arith.addf %318, %317 : vector<8x32xf32>
    %320 = arith.divf %318, %319 : vector<8x32xf32>
    %321 = arith.mulf %312, %268 : vector<8x32xf32>
    %322 = arith.mulf %306, %314 : vector<8x32xf32>
    %323 = arith.addf %321, %322 : vector<8x32xf32>
    %324 = math.tanh %323 : vector<8x32xf32>
    %325 = arith.mulf %320, %324 : vector<8x32xf32>
    %c4_i32_83 = arith.constant 4 : i32
    %326 = vector.broadcast %c4_i32_83 : i32 to vector<8x32xi32>
    %327 = arith.cmpi sgt, %21, %326 : vector<8x32xi32>
    %328 = arith.select %327, %325, %267 : vector<8x32xi1>, vector<8x32xf32>
    %329 = arith.select %327, %323, %268 : vector<8x32xi1>, vector<8x32xf32>
    %cst_84 = arith.constant 0.000000e+00 : f32
    %330 = vector.broadcast %cst_84 : f32 to vector<8x32xf32>
    %331 = arith.select %327, %325, %330 : vector<8x32xi1>, vector<8x32xf32>
    %332 = vector.extract_strided_slice %0 {offsets = [40, 0], sizes = [8, 72], strides = [1, 1]} : vector<64x72xf32> to vector<8x72xf32>
    %cst_85 = arith.constant dense<0.000000e+00> : vector<8x32xf32>
    %333 = tpu.matmul %331, %13, %cst_85 {dimension_numbers = #tpu.dot_dimension_numbers<[1], [0], [0], [1], [0, 0, 1, 1], [], []>} : vector<8x32xf32>, vector<32x32xf32>, vector<8x32xf32> -> vector<8x32xf32>
    %334 = vector.extract_strided_slice %11 {offsets = [40, 0], sizes = [8, 32], strides = [1, 1]} : vector<64x32xf32> to vector<8x32xf32>
    %335 = arith.addf %333, %334 : vector<8x32xf32>
    %cst_86 = arith.constant 0.000000e+00 : f32
    %336 = vector.broadcast %cst_86 : f32 to vector<8x32xf32>
    %337 = arith.maximumf %335, %336 : vector<8x32xf32>
    %cst_87 = arith.constant dense<0.000000e+00> : vector<8x32xf32>
    %338 = tpu.matmul %337, %14, %cst_87 {dimension_numbers = #tpu.dot_dimension_numbers<[1], [0], [0], [1], [0, 0, 1, 1], [], []>} : vector<8x32xf32>, vector<32x32xf32>, vector<8x32xf32> -> vector<8x32xf32>
    %339 = vector.broadcast %15 : vector<1x32xf32> to vector<8x32xf32>
    %340 = arith.addf %338, %339 : vector<8x32xf32>
    %cst_88 = arith.constant 0.000000e+00 : f32
    %341 = vector.broadcast %cst_88 : f32 to vector<8x32xf32>
    %342 = arith.maximumf %340, %341 : vector<8x32xf32>
    %343 = vector.extract_strided_slice %332 {offsets = [0, 40], sizes = [8, 32], strides = [1, 1]} : vector<8x72xf32> to vector<8x32xf32>
    %344 = arith.mulf %331, %343 : vector<8x32xf32>
    %345 = vector.broadcast %16 : vector<1x32xf32> to vector<8x32xf32>
    %346 = arith.mulf %344, %345 : vector<8x32xf32>
    %347 = vector.broadcast %17 : vector<1x32xf32> to vector<8x32xf32>
    %348 = arith.mulf %342, %347 : vector<8x32xf32>
    %349 = arith.addf %346, %348 : vector<8x32xf32>
    %cst_89 = arith.constant dense<0.000000e+00> : vector<8xf32>
    %350 = vector.multi_reduction <add>, %349, %cst_89 [1] : vector<8x32xf32> to vector<8xf32>
    %351 = vector.shape_cast %350 : vector<8xf32> to vector<8x1xf32>
    %352 = vector.broadcast %18 : vector<1x1xf32> to vector<8x1xf32>
    %353 = arith.addf %351, %352 : vector<8x1xf32>
    %c5_i32 = arith.constant 5 : i32
    %354 = vector.broadcast %c5_i32 : i32 to vector<8x8xi32>
    %355 = arith.cmpi eq, %22, %354 : vector<8x8xi32>
    %356 = vector.shape_cast %353 : vector<8x1xf32> to vector<8x1xf32>
    %357 = vector.broadcast %356 : vector<8x1xf32> to vector<8x8xf32>
    %358 = arith.select %355, %357, %297 : vector<8x8xi1>, vector<8x8xf32>
    %359 = vector.extract_strided_slice %5 {offsets = [40, 0], sizes = [8, 128], strides = [1, 1]} : vector<64x128xf32> to vector<8x128xf32>
    %cst_90 = arith.constant dense<0.000000e+00> : vector<8x128xf32>
    %360 = tpu.matmul %328, %12, %cst_90 {dimension_numbers = #tpu.dot_dimension_numbers<[1], [0], [0], [1], [0, 0, 1, 1], [], []>} : vector<8x32xf32>, vector<32x128xf32>, vector<8x128xf32> -> vector<8x128xf32>
    %361 = arith.addf %359, %360 : vector<8x128xf32>
    %362 = vector.extract_strided_slice %361 {offsets = [0, 0], sizes = [8, 32], strides = [1, 1]} : vector<8x128xf32> to vector<8x32xf32>
    %363 = arith.negf %362 : vector<8x32xf32>
    %364 = math.exp %363 : vector<8x32xf32>
    %cst_91 = arith.constant 1.000000e+00 : f32
    %365 = vector.broadcast %cst_91 : f32 to vector<8x32xf32>
    %366 = arith.addf %365, %364 : vector<8x32xf32>
    %367 = arith.divf %365, %366 : vector<8x32xf32>
    %368 = vector.extract_strided_slice %361 {offsets = [0, 32], sizes = [8, 32], strides = [1, 1]} : vector<8x128xf32> to vector<8x32xf32>
    %369 = arith.negf %368 : vector<8x32xf32>
    %370 = math.exp %369 : vector<8x32xf32>
    %cst_92 = arith.constant 1.000000e+00 : f32
    %371 = vector.broadcast %cst_92 : f32 to vector<8x32xf32>
    %372 = arith.addf %371, %370 : vector<8x32xf32>
    %373 = arith.divf %371, %372 : vector<8x32xf32>
    %374 = vector.extract_strided_slice %361 {offsets = [0, 64], sizes = [8, 32], strides = [1, 1]} : vector<8x128xf32> to vector<8x32xf32>
    %375 = math.tanh %374 : vector<8x32xf32>
    %376 = vector.extract_strided_slice %361 {offsets = [0, 96], sizes = [8, 32], strides = [1, 1]} : vector<8x128xf32> to vector<8x32xf32>
    %377 = arith.negf %376 : vector<8x32xf32>
    %378 = math.exp %377 : vector<8x32xf32>
    %cst_93 = arith.constant 1.000000e+00 : f32
    %379 = vector.broadcast %cst_93 : f32 to vector<8x32xf32>
    %380 = arith.addf %379, %378 : vector<8x32xf32>
    %381 = arith.divf %379, %380 : vector<8x32xf32>
    %382 = arith.mulf %373, %329 : vector<8x32xf32>
    %383 = arith.mulf %367, %375 : vector<8x32xf32>
    %384 = arith.addf %382, %383 : vector<8x32xf32>
    %385 = math.tanh %384 : vector<8x32xf32>
    %386 = arith.mulf %381, %385 : vector<8x32xf32>
    %c5_i32_94 = arith.constant 5 : i32
    %387 = vector.broadcast %c5_i32_94 : i32 to vector<8x32xi32>
    %388 = arith.cmpi sgt, %21, %387 : vector<8x32xi32>
    %389 = arith.select %388, %386, %328 : vector<8x32xi1>, vector<8x32xf32>
    %390 = arith.select %388, %384, %329 : vector<8x32xi1>, vector<8x32xf32>
    %cst_95 = arith.constant 0.000000e+00 : f32
    %391 = vector.broadcast %cst_95 : f32 to vector<8x32xf32>
    %392 = arith.select %388, %386, %391 : vector<8x32xi1>, vector<8x32xf32>
    %393 = vector.extract_strided_slice %0 {offsets = [48, 0], sizes = [8, 72], strides = [1, 1]} : vector<64x72xf32> to vector<8x72xf32>
    %cst_96 = arith.constant dense<0.000000e+00> : vector<8x32xf32>
    %394 = tpu.matmul %392, %13, %cst_96 {dimension_numbers = #tpu.dot_dimension_numbers<[1], [0], [0], [1], [0, 0, 1, 1], [], []>} : vector<8x32xf32>, vector<32x32xf32>, vector<8x32xf32> -> vector<8x32xf32>
    %395 = vector.extract_strided_slice %11 {offsets = [48, 0], sizes = [8, 32], strides = [1, 1]} : vector<64x32xf32> to vector<8x32xf32>
    %396 = arith.addf %394, %395 : vector<8x32xf32>
    %cst_97 = arith.constant 0.000000e+00 : f32
    %397 = vector.broadcast %cst_97 : f32 to vector<8x32xf32>
    %398 = arith.maximumf %396, %397 : vector<8x32xf32>
    %cst_98 = arith.constant dense<0.000000e+00> : vector<8x32xf32>
    %399 = tpu.matmul %398, %14, %cst_98 {dimension_numbers = #tpu.dot_dimension_numbers<[1], [0], [0], [1], [0, 0, 1, 1], [], []>} : vector<8x32xf32>, vector<32x32xf32>, vector<8x32xf32> -> vector<8x32xf32>
    %400 = vector.broadcast %15 : vector<1x32xf32> to vector<8x32xf32>
    %401 = arith.addf %399, %400 : vector<8x32xf32>
    %cst_99 = arith.constant 0.000000e+00 : f32
    %402 = vector.broadcast %cst_99 : f32 to vector<8x32xf32>
    %403 = arith.maximumf %401, %402 : vector<8x32xf32>
    %404 = vector.extract_strided_slice %393 {offsets = [0, 40], sizes = [8, 32], strides = [1, 1]} : vector<8x72xf32> to vector<8x32xf32>
    %405 = arith.mulf %392, %404 : vector<8x32xf32>
    %406 = vector.broadcast %16 : vector<1x32xf32> to vector<8x32xf32>
    %407 = arith.mulf %405, %406 : vector<8x32xf32>
    %408 = vector.broadcast %17 : vector<1x32xf32> to vector<8x32xf32>
    %409 = arith.mulf %403, %408 : vector<8x32xf32>
    %410 = arith.addf %407, %409 : vector<8x32xf32>
    %cst_100 = arith.constant dense<0.000000e+00> : vector<8xf32>
    %411 = vector.multi_reduction <add>, %410, %cst_100 [1] : vector<8x32xf32> to vector<8xf32>
    %412 = vector.shape_cast %411 : vector<8xf32> to vector<8x1xf32>
    %413 = vector.broadcast %18 : vector<1x1xf32> to vector<8x1xf32>
    %414 = arith.addf %412, %413 : vector<8x1xf32>
    %c6_i32 = arith.constant 6 : i32
    %415 = vector.broadcast %c6_i32 : i32 to vector<8x8xi32>
    %416 = arith.cmpi eq, %22, %415 : vector<8x8xi32>
    %417 = vector.shape_cast %414 : vector<8x1xf32> to vector<8x1xf32>
    %418 = vector.broadcast %417 : vector<8x1xf32> to vector<8x8xf32>
    %419 = arith.select %416, %418, %358 : vector<8x8xi1>, vector<8x8xf32>
    %420 = vector.extract_strided_slice %5 {offsets = [48, 0], sizes = [8, 128], strides = [1, 1]} : vector<64x128xf32> to vector<8x128xf32>
    %cst_101 = arith.constant dense<0.000000e+00> : vector<8x128xf32>
    %421 = tpu.matmul %389, %12, %cst_101 {dimension_numbers = #tpu.dot_dimension_numbers<[1], [0], [0], [1], [0, 0, 1, 1], [], []>} : vector<8x32xf32>, vector<32x128xf32>, vector<8x128xf32> -> vector<8x128xf32>
    %422 = arith.addf %420, %421 : vector<8x128xf32>
    %423 = vector.extract_strided_slice %422 {offsets = [0, 0], sizes = [8, 32], strides = [1, 1]} : vector<8x128xf32> to vector<8x32xf32>
    %424 = arith.negf %423 : vector<8x32xf32>
    %425 = math.exp %424 : vector<8x32xf32>
    %cst_102 = arith.constant 1.000000e+00 : f32
    %426 = vector.broadcast %cst_102 : f32 to vector<8x32xf32>
    %427 = arith.addf %426, %425 : vector<8x32xf32>
    %428 = arith.divf %426, %427 : vector<8x32xf32>
    %429 = vector.extract_strided_slice %422 {offsets = [0, 32], sizes = [8, 32], strides = [1, 1]} : vector<8x128xf32> to vector<8x32xf32>
    %430 = arith.negf %429 : vector<8x32xf32>
    %431 = math.exp %430 : vector<8x32xf32>
    %cst_103 = arith.constant 1.000000e+00 : f32
    %432 = vector.broadcast %cst_103 : f32 to vector<8x32xf32>
    %433 = arith.addf %432, %431 : vector<8x32xf32>
    %434 = arith.divf %432, %433 : vector<8x32xf32>
    %435 = vector.extract_strided_slice %422 {offsets = [0, 64], sizes = [8, 32], strides = [1, 1]} : vector<8x128xf32> to vector<8x32xf32>
    %436 = math.tanh %435 : vector<8x32xf32>
    %437 = vector.extract_strided_slice %422 {offsets = [0, 96], sizes = [8, 32], strides = [1, 1]} : vector<8x128xf32> to vector<8x32xf32>
    %438 = arith.negf %437 : vector<8x32xf32>
    %439 = math.exp %438 : vector<8x32xf32>
    %cst_104 = arith.constant 1.000000e+00 : f32
    %440 = vector.broadcast %cst_104 : f32 to vector<8x32xf32>
    %441 = arith.addf %440, %439 : vector<8x32xf32>
    %442 = arith.divf %440, %441 : vector<8x32xf32>
    %443 = arith.mulf %434, %390 : vector<8x32xf32>
    %444 = arith.mulf %428, %436 : vector<8x32xf32>
    %445 = arith.addf %443, %444 : vector<8x32xf32>
    %446 = math.tanh %445 : vector<8x32xf32>
    %447 = arith.mulf %442, %446 : vector<8x32xf32>
    %c6_i32_105 = arith.constant 6 : i32
    %448 = vector.broadcast %c6_i32_105 : i32 to vector<8x32xi32>
    %449 = arith.cmpi sgt, %21, %448 : vector<8x32xi32>
    %cst_106 = arith.constant 0.000000e+00 : f32
    %450 = vector.broadcast %cst_106 : f32 to vector<8x32xf32>
    %451 = arith.select %449, %447, %450 : vector<8x32xi1>, vector<8x32xf32>
    %452 = vector.extract_strided_slice %0 {offsets = [56, 0], sizes = [8, 72], strides = [1, 1]} : vector<64x72xf32> to vector<8x72xf32>
    %cst_107 = arith.constant dense<0.000000e+00> : vector<8x32xf32>
    %453 = tpu.matmul %451, %13, %cst_107 {dimension_numbers = #tpu.dot_dimension_numbers<[1], [0], [0], [1], [0, 0, 1, 1], [], []>} : vector<8x32xf32>, vector<32x32xf32>, vector<8x32xf32> -> vector<8x32xf32>
    %454 = vector.extract_strided_slice %11 {offsets = [56, 0], sizes = [8, 32], strides = [1, 1]} : vector<64x32xf32> to vector<8x32xf32>
    %455 = arith.addf %453, %454 : vector<8x32xf32>
    %cst_108 = arith.constant 0.000000e+00 : f32
    %456 = vector.broadcast %cst_108 : f32 to vector<8x32xf32>
    %457 = arith.maximumf %455, %456 : vector<8x32xf32>
    %cst_109 = arith.constant dense<0.000000e+00> : vector<8x32xf32>
    %458 = tpu.matmul %457, %14, %cst_109 {dimension_numbers = #tpu.dot_dimension_numbers<[1], [0], [0], [1], [0, 0, 1, 1], [], []>} : vector<8x32xf32>, vector<32x32xf32>, vector<8x32xf32> -> vector<8x32xf32>
    %459 = vector.broadcast %15 : vector<1x32xf32> to vector<8x32xf32>
    %460 = arith.addf %458, %459 : vector<8x32xf32>
    %cst_110 = arith.constant 0.000000e+00 : f32
    %461 = vector.broadcast %cst_110 : f32 to vector<8x32xf32>
    %462 = arith.maximumf %460, %461 : vector<8x32xf32>
    %463 = vector.extract_strided_slice %452 {offsets = [0, 40], sizes = [8, 32], strides = [1, 1]} : vector<8x72xf32> to vector<8x32xf32>
    %464 = arith.mulf %451, %463 : vector<8x32xf32>
    %465 = vector.broadcast %16 : vector<1x32xf32> to vector<8x32xf32>
    %466 = arith.mulf %464, %465 : vector<8x32xf32>
    %467 = vector.broadcast %17 : vector<1x32xf32> to vector<8x32xf32>
    %468 = arith.mulf %462, %467 : vector<8x32xf32>
    %469 = arith.addf %466, %468 : vector<8x32xf32>
    %cst_111 = arith.constant dense<0.000000e+00> : vector<8xf32>
    %470 = vector.multi_reduction <add>, %469, %cst_111 [1] : vector<8x32xf32> to vector<8xf32>
    %471 = vector.shape_cast %470 : vector<8xf32> to vector<8x1xf32>
    %472 = vector.broadcast %18 : vector<1x1xf32> to vector<8x1xf32>
    %473 = arith.addf %471, %472 : vector<8x1xf32>
    %c7_i32 = arith.constant 7 : i32
    %474 = vector.broadcast %c7_i32 : i32 to vector<8x8xi32>
    %475 = arith.cmpi eq, %22, %474 : vector<8x8xi32>
    %476 = vector.shape_cast %473 : vector<8x1xf32> to vector<8x1xf32>
    %477 = vector.broadcast %476 : vector<8x1xf32> to vector<8x8xf32>
    %478 = arith.select %475, %477, %419 : vector<8x8xi1>, vector<8x8xf32>
    %479 = arith.negf %478 : vector<8x8xf32>
    %480 = math.exp %479 : vector<8x8xf32>
    %cst_112 = arith.constant 1.000000e+00 : f32
    %481 = vector.broadcast %cst_112 : f32 to vector<8x8xf32>
    %482 = arith.addf %481, %480 : vector<8x8xf32>
    %483 = arith.divf %481, %482 : vector<8x8xf32>
    %c0_113 = arith.constant 0 : index
    %c0_114 = arith.constant 0 : index
    %484 = vector.load %arg13[%c0_113, %c0_114] : memref<8x8xf32, #tpu.memory_space<vmem>>, vector<8x8xf32>
    tpu.vector_store %arg13[%c0_113, %c0_114], %483 {strides = array<i32>} : memref<8x8xf32, #tpu.memory_space<vmem>>, vector<8x8xf32>,
    return
  }
}

</mosaic_0001>

<bundles_post_ra>
// kernel: rrncf_forward.1
= control target key start
LH: loop header
LB: loop body
LE: loop exit
PB: predicated region body
PF: predicated region fallthrough
CT: control target
= control target key end

     0   :  { %vm70_vm0 = vcmask 588800   ;;  %v3091_v13 = vmov 0.0   ;;  %vm3092_vm1 = vmmov 0   ;;  %v3093_v22 = vmov 0   ;;  %s3095_s25 = smov 32   ;;  %s3096_s24 = smov 40   ;;  %s3933_s2 = inlined_call_operand.vmem [shape: f32[72,128], index: 2, kind: input, shape index: {}]   ;;  %s3934_s0 = inlined_call_operand.vmem [shape: f32[64,72], index: 0, kind: input, shape index: {}]   ;;  %s3935_s3 = inlined_call_operand.vmem [shape: f32[32,128], index: 3, kind: input, shape index: {}]   ;;  %s3936_s1 = inlined_call_operand.vmem [shape: s32[8,1], index: 1, kind: input, shape index: {}]   ;;  %s3937_s4 = inlined_call_operand.vmem [shape: f32[1,128], index: 4, kind: input, shape index: {}]   ;;  %s3938_s6 = inlined_call_operand.vmem [shape: f32[32,32], index: 6, kind: input, shape index: {}]   ;;  %s3939_s5 = inlined_call_operand.vmem [shape: f32[32,32], index: 5, kind: input, shape index: {}]   ;;  %s3940_s8 = inlined_call_operand.vmem [shape: f32[32,32], index: 8, kind: input, shape index: {}]   ;;  %s3941_s7 = inlined_call_operand.vmem [shape: f32[1,32], index: 7, kind: input, shape index: {}]   ;;  %s3942_s10 = inlined_call_operand.vmem [shape: f32[1,32], index: 10, kind: input, shape index: {}]   ;;  %s3943_s9 = inlined_call_operand.vmem [shape: f32[1,32], index: 9, kind: input, shape index: {}]   ;;  %s3944_s11 = inlined_call_operand.vmem [shape: f32[1,32], index: 11, kind: input, shape index: {}]   ;;  %s3945_s12 = inlined_call_operand.<no memory space> [shape: f32[1,1], index: 12, kind: input, shape index: {}]   ;;  %s3946_s13 = inlined_call_operand.vmem [shape: f32[8,8], index: 13, kind: output, shape index: {}]  }
   0x1   :  { %v62_v0 = vld [vmem:[%s3933_s2 + $0x40] sm:$0xff]  ;;  %v61_v1 = vld [vmem:[%s3933_s2 + $0x38] sm:$0xff]  ;;  %v60_v2 = vld [vmem:[%s3933_s2 + $0x30] sm:$0xff]  ;;  %3020 = vset.pattern.permute.xlu1 %v3093_v22  ;;  %3021 = vset.pattern.permute.xlu0 %v3093_v22  ;;  %vm210_vm2 = vcmask 261120   ;;  %s3098_s30 = smov 56   ;;  %s3099_s14 = smov 96  }
   0x2   :  { %2708 = vmatprep.subr.mxu0 %v62_v0  ;;  %v3182_v3 = vld [vmem:[%s3934_s0] sm:$0xff]  ;;  %v59_v4 = vld [vmem:[%s3933_s2 + $0x28] sm:$0xff]  ;;  %v57_v6 = vld [vmem:[%s3933_s2 + $0x18] sm:$0xff] }
   0x3   :  { %2709 = vmatpush3.msra.mxu0 %v62_v0  ;;  %2726 = vmatprep.mubr.msk.f32.mxu0 %vm70_vm0, %v3182_v3  ;;  %v58_v5 = vld [vmem:[%s3933_s2 + $0x20] sm:$0xff]  ;;  %v56_v7 = vld [vmem:[%s3933_s2 + $0x10] sm:$0xff]  ;;  %v55_v8 = vld [vmem:[%s3933_s2 + $0x8] sm:$0xff] }
   0x4   :  { %2710 = vmatprep.subr.mxu0 %v61_v1  ;;  %v54_v9 = vld [vmem:[%s3933_s2] sm:$0xff]  ;;  %v3207_v10 = vld [vmem:[%s3934_s0 + $0x8] sm:$0xff]  ;;  %v3212_v11 = vld [vmem:[%s3935_s3 + $0x18] sm:$0xff]  ;;  %2746 = vmatprep.mubr.msk.f32.mxu1 %vm210_vm2, %v3182_v3 }
   0x5   :  { %2711 = vmatpush3.msra.mxu0 %v61_v1  ;;  %v3217_v12 = vld [vmem:[%s3934_s0 + $0x10] sm:$0xff]  ;;  %v3233_v15 = vld [vmem:[%s3934_s0 + $0x18] sm:$0xff]  ;;  %v3239_v16 = vld [vmem:[%s3934_s0 + $0x20] sm:$0xff] }
   0x6   :  { %2712 = vmatprep.subr.mxu0 %v60_v2  ;;  %v3225_v14 = vld [vmem:[%s3935_s3 + $0x10] sm:$0xff]  ;;  %v3244_v17 = vld [vmem:[%s3935_s3 + $0x8] sm:$0xff]  ;;  %v3253_v18 = vld [vmem:[%s3935_s3] sm:$0xff] }
   0x7   :  { %2713 = vmatpush3.msra.mxu0 %v60_v2  ;;  %v3260_v19 = vld [vmem:[%s3934_s0 + $0x28] sm:$0xff]  ;;  %v3266_v20 = vld [vmem:[%s3934_s0 + $0x30] sm:$0xff]  ;;  %v3278_v21 = vld [vmem:[%s3934_s0 + $0x38] sm:$0xff] }
   0x8   :  { %2714 = vmatprep.subr.mxu0 %v59_v4  ;;  %v348_v23 = vld [vmem:[%s3936_s1] sm:$0xff]  ;;  %s3094_s1 = smov 64   ;;  %v202_v47 = vld [vmem:[%s3938_s6 + $0x18] sm:$0xff]  ;;  %v201_v48 = vld [vmem:[%s3938_s6 + $0x10] sm:$0xff] }
   0x9   :  { %2715 = vmatpush3.msra.mxu0 %v59_v4  ;;  %350 = vperm.xlu1 %3020, %v348_v23   ;;  %v2513_v24 = vld [vmem:[%s3937_s4] ss:$0 sm:$0xff]  ;;  %v200_v49 = vld [vmem:[%s3938_s6 + $0x8] sm:$0xff]  ;;  %v3336_v54 = vld [vmem:[%s3939_s5 + $0x18] sm:$0xff] }
   0xa   :  { %2716 = vmatprep.subr.mxu0 %v58_v5  ;;  %2738 = vmatprep.subr.mxu1 %v202_v47  ;;  %v199_v50 = vld [vmem:[%s3938_s6] sm:$0xff]  ;;  %v3342_v55 = vld [vmem:[%s3939_s5 + $0x10] sm:$0xff]  ;;  %v3350_v56 = vld [vmem:[%s3939_s5 + $0x8] sm:$0xff] }
   0xb   :  { %2717 = vmatpush3.msra.mxu0 %v58_v5  ;;  %2739 = vmatpush3.msra.mxu1 %v202_v47  ;;  %v3359_v57 = vld [vmem:[%s3939_s5] sm:$0xff]  ;;  %v3379_v61 = vld [vmem:[%s3940_s8 + $0x18] sm:$0xff]  ;;  %v3384_v62 = vld [vmem:[%s3940_s8 + $0x10] sm:$0xff] }
   0xc   :  { %2718 = vmatprep.subr.mxu0 %v57_v6  ;;  %2740 = vmatprep.subr.mxu1 %v201_v48  ;;  %v3392_v63 = vld [vmem:[%s3940_s8 + $0x8] sm:$0xff]  ;;  %v3401_v0 = vld [vmem:[%s3940_s8] sm:$0xff] }
   0xd   :  { %2719 = vmatpush3.msra.mxu0 %v57_v6  ;;  %2741 = vmatpush3.msra.mxu1 %v201_v48  ;;  %v2522_v3 = vld [vmem:[%s3941_s7] ss:$0 sm:$0xff] }
   0xe   :  { %2720 = vmatprep.subr.mxu0 %v56_v7  ;;  %2742 = vmatprep.subr.mxu1 %v200_v49 }
   0xf   :  { %2721 = vmatpush3.msra.mxu0 %v56_v7  ;;  %2743 = vmatpush3.msra.mxu1 %v200_v49 }
  0x10   :  { %2722 = vmatprep.subr.mxu0 %v55_v8  ;;  %2744 = vmatprep.subr.mxu1 %v199_v50 }
  0x11   :  { %2723 = vmatpush3.msra.mxu0 %v55_v8  ;;  %2745 = vmatpush3.msra.mxu1 %v199_v50 }
  0x12   :  { %2724 = vmatprep.subr.mxu0 %v54_v9  ;;  %2747 = vmatmul.mubr.msk.f32.vlgmr.msra.gmra.mxu1 %vm210_vm2, %v3207_v10 }
  0x13   :  { %2725 = vmatpush3.msra.mxu0 %v54_v9  ;;  %2758 = vmatprep.subr.mxu1 %v3091_v13 }
  0x14   :  { %2727 = vmatmul.mubr.msk.f32.vlgmr.msra.gmra.mxu0 %vm70_vm0, %v3207_v10  ;;  %2780 = vmatprep.subr.mxu0 %v3091_v13 }
  0x15   :  { %2781 = vmatpush3.msra.mxu0 %v3212_v11  ;;  %2729 = vmatprep.mubr.msk.f32.mxu0 %vm70_vm0, %v3217_v12 }
  0x16   :  { %2782 = vmatprep.subr.mxu0 %v3091_v13  ;;  %2749 = vmatprep.mubr.msk.f32.mxu1 %vm210_vm2, %v3217_v12 }
  0x17   :  { %2783 = vmatpush3.msra.mxu0 %v3225_v14  ;;  %2750 = vmatmul.mubr.msk.f32.gmra.mxu1 %vm210_vm2, %v3233_v15 }
  0x18   :  { %2730 = vmatmul.mubr.msk.f32.gmra.mxu0 %vm70_vm0, %v3233_v15  ;;  %2784 = vmatprep.subr.mxu0 %v3091_v13 }
  0x19   :  { %2732 = vmatprep.mubr.msk.f32.mxu0 %vm70_vm0, %v3239_v16  ;;  %2785 = vmatpush3.msra.mxu0 %v3244_v17 }
  0x1a   :  { %2786 = vmatprep.subr.mxu0 %v3091_v13  ;;  %2752 = vmatprep.mubr.msk.f32.mxu1 %vm210_vm2, %v3239_v16 }
  0x1b   :  { %2787 = vmatpush3.msra.mxu0 %v3253_v18  ;;  %2759 = vmatpush3.msra.mxu1 %v3336_v54 }
  0x1c   :  { %2733 = vmatmul.mubr.msk.f32.gmra.mxu0 %vm70_vm0, %v3260_v19  ;;  %2802 = vmatprep.subr.mxu0 %v3091_v13 }
  0x1d   :  { %2735 = vmatprep.mubr.msk.f32.mxu0 %vm70_vm0, %v3266_v20  ;;  %2760 = vmatprep.subr.mxu1 %v3091_v13 }
  0x1e   :  { %2753 = vmatmul.mubr.msk.f32.gmra.mxu1 %vm210_vm2, %v3260_v19 }
  0x1f   :  { %2755 = vmatprep.mubr.msk.f32.mxu1 %vm210_vm2, %v3266_v20  ;;  %2761 = vmatpush3.msra.mxu1 %v3342_v55 }
  0x20   :  { %2736 = vmatmul.mubr.msk.f32.gmra.mxu0 %vm70_vm0, %v3278_v21  ;;  %2762 = vmatprep.subr.mxu1 %v3091_v13 }
  0x21   :  { %2788 = vmatprep.mubr.msk.f32.mxu0 %vm3092_vm1, %v3091_v13  ;;  %2763 = vmatpush3.msra.mxu1 %v3350_v56 }
  0x22   :  { %2756 = vmatmul.mubr.msk.f32.gmra.mxu1 %vm210_vm2, %v3278_v21  ;;  %2764 = vmatprep.subr.mxu1 %v3091_v13 }
  0x23   :  { %2765 = vmatpush3.msra.mxu1 %v3359_v57  ;;  %2766 = vmatprep.mubr.msk.f32.mxu1 %vm3092_vm1, %v3091_v13 }
  0x24   :  { %2789 = vmatmul.mubr.f32.vlgmr.msra.gmra.mxu0 %v3091_v13  ;;  %2769 = vmatprep.subr.mxu1 %v3091_v13 }
  0x25   :  { %2810 = vmatprep.mubr.msk.f32.mxu0 %vm3092_vm1, %v3091_v13  ;;  %2803 = vmatpush3.msra.mxu0 %v3379_v61 }
  0x26   :  { %2767 = vmatmul.mubr.f32.vlgmr.msra.gmra.mxu1 %v3091_v13  ;;  %2804 = vmatprep.subr.mxu0 %v3091_v13 }
  0x27   :  { %2777 = vmatprep.mubr.msk.f32.mxu1 %vm3092_vm1, %v3091_v13  ;;  %2770 = vmatpush3.msra.mxu1 %v3379_v61 }
  0x28   :  { %2771 = vmatprep.subr.mxu1 %v3091_v13  ;;  %2805 = vmatpush3.msra.mxu0 %v3384_v62 }
  0x29   :  { %2772 = vmatpush3.msra.mxu1 %v3384_v62  ;;  %2806 = vmatprep.subr.mxu0 %v3091_v13 }
  0x2a   :  { %2773 = vmatprep.subr.mxu1 %v3091_v13  ;;  %2807 = vmatpush3.msra.mxu0 %v3392_v63 }
  0x2b   :  { %2774 = vmatpush3.msra.mxu1 %v3392_v63  ;;  %2808 = vmatprep.subr.mxu0 %v3091_v13 }
  0x2c   :  { %2775 = vmatprep.subr.mxu1 %v3091_v13  ;;  %2809 = vmatpush3.msra.mxu0 %v3401_v0 }
  0x2d   :  { %2776 = vmatpush3.msra.mxu1 %v3401_v0  ;;  %2824 = vmatprep.subr.mxu0 %v3091_v13 }
  0x2e   :  { %2791 = vmatprep.subr.mxu1 %v3091_v13 }
  0xd2   :  { %v2748_v2 = vpop.f32.mrf.mxu1 }
  0xd3   :  { %v299_v4 = vadd.f32 %v2748_v2, %v2522_v3 }
  0xd4   :  { %v2728_v25 = vpop.f32.mrf.mxu0  ;;  %v293_v5 = vpop.f32.mrf.mxu1 }
  0xd5   :  { %v3293_v26 = vadd.f32 %v2728_v25, %v2513_v24  ;;  %v294_v20 = vadd.f32 %v2522_v3, %v293_v5 }
  0xd6   :  { %v161_v27 = vpop.f32.mrf.mxu0 }
  0xd7   :  { %v162_v38 = vadd.f32 %v2513_v24, %v161_v27  ;;  %v2751_v6 = vpop.f32.mrf.mxu1 }
  0xd8   :  { %v2731_v28 = vpop.f32.mrf.mxu0  ;;  %v3416_v7 = vadd.f32 %v2751_v6, %v2522_v3 }
  0xd9   :  { %v3295_v29 = vadd.f32 %v2731_v28, %v2513_v24  ;;  %v303_v8 = vpop.f32.mrf.mxu1 }
  0xda   :  { %v171_v30 = vpop.f32.mrf.mxu0  ;;  %v3418_v9 = vadd.f32 %v2522_v3, %v303_v8 }
  0xdb   :  { %v3297_v31 = vadd.f32 %v2513_v24, %v171_v30  ;;  %v3439_v30 = vpop.permute.xlu1 %350 }
  0xdc   :  { %v2734_v32 = vpop.f32.mrf.mxu0  ;;  %vm646_vm3 = vcmp.gt.s32.totalorder %v3439_v30, 0  ;;  %vm923_vm4 = vcmp.gt.s32.totalorder %v3439_v30, 1  ;;  %vm1203_vm5 = vcmp.gt.s32.totalorder %v3439_v30, 2  ;;  %vm1483_vm6 = vcmp.gt.s32.totalorder %v3439_v30, 3 }
  0xdd   :  { %v3299_v33 = vadd.f32 %v2734_v32, %v2513_v24  ;;  %vm1763_vm7 = vcmp.gt.s32.totalorder %v3439_v30, 4  ;;  %vm2043_vm8 = vcmp.gt.s32.totalorder %v3439_v30, 5  ;;  %vm2323_vm9 = vcmp.gt.s32.totalorder %v3439_v30, 6 }
  0xde   :  { %v181_v34 = vpop.f32.mrf.mxu0  ;;  %v2754_v10 = vpop.f32.mrf.mxu1 }
  0xdf   :  { %v3301_v35 = vadd.f32 %v2513_v24, %v181_v34  ;;  %v3420_v12 = vadd.f32 %v2754_v10, %v2522_v3 }
  0xe0   :  { %v2737_v36 = vpop.f32.mrf.mxu0  ;;  %v313_v15 = vpop.f32.mrf.mxu1 }
  0xe1   :  { %v3422_v16 = vadd.f32 %v2522_v3, %v313_v15 }
  0xe2   :  { %v191_v37 = vpop.f32.mrf.mxu0  ;;  %v2757_v19 = vpop.f32.mrf.mxu1 }
  0xe3   :  { %v3303_v39 = vadd.f32 %v2513_v24, %v191_v37  ;;  %v3424_v21 = vadd.f32 %v2757_v19, %v2522_v3 }
  0xe4   :  { %v617_v40 = vpop.f32.mrf.mxu0  ;;  %v323_v22 = vpop.f32.mrf.mxu1 }
  0xe5   :  { %v621_v41 = vadd.f32 %v617_v40, %v162_v38  ;;  %v3426_v23 = vadd.f32 %v2522_v3, %v323_v22 }
  0xe6   :  { %v2790_v42 = vpop.f32.mrf.mxu0  ;;  %v423_v24 = vpop.f32.mrf.mxu1 }
  0xe7   :  { %3022 = vtanh.f32 %v621_v41  ;;  %v2536_v44 = vmul.f32 -1.442695, %v621_v41  ;;  %v424_v25 = vadd.f32 %v423_v24, %v294_v20 }
  0xe8   :  { %v2768_v27 = vpop.f32.mrf.mxu1 }
  0xe9   :  { %3024 = vpow2.f32 %v2536_v44  ;;  %v427_v28 = vmax.f32 %v424_v25, 0.0 }
  0xeb   :  { %2778 = vmatmul.mubr.msk.f32.vlgmr.msra.gmra.mxu1 %vm210_vm2, %v427_v28 }
  0xec   :  { %2792 = vmatpush3.msra.mxu1 %v3336_v54  ;;  %2799 = vmatprep.mubr.msk.f32.mxu1 %vm3092_vm1, %v3091_v13 }
  0xed   :  { %2793 = vmatprep.subr.mxu1 %v3091_v13 }
  0xee   :  { %2794 = vmatpush3.msra.mxu1 %v3342_v55 }
  0xef   :  { %2795 = vmatprep.subr.mxu1 %v3091_v13 }
  0xf0   :  { %2796 = vmatpush3.msra.mxu1 %v3350_v56 }
  0xf1   :  { %2797 = vmatprep.subr.mxu1 %v3091_v13 }
  0xf2   :  { %2798 = vmatpush3.msra.mxu1 %v3359_v57 }
  0xf3   :  { %2813 = vmatprep.subr.mxu1 %v3091_v13 }
  0xf4   :  { %v3023_v43 = vpop.eup %3022 }
  0xf5   :  { %631 = vrot.lane.b32.xlu0 %v3023_v43, %s3094_s1 }
  0xf6   :  { %v3025_v45 = vpop.eup %3024 }
  0xf7   :  { %v625_v46 = vadd.f32 1.0, %v3025_v45 }
  0xf9   :  { %3026 = vrcp.f32 %v625_v46 }
 0x106   :  { %v3320_v51 = vpop.eup %3026 }
 0x107   :  { %v629_v58 = vmul.f32 0.0, %v3320_v51 }
 0x167   :  { %v632_v52 = vpop.permute.xlu0 %631 }
 0x168   :  { %v634_v53 = vmul.f32 %v3320_v51, %v632_v52 }
 0x16a   :  { %636 = vrot.lane.b32.xlu0 %v634_v53, %s3095_s25 }
 0x1ab   :  { %v3471_v38 = vpop.f32.mrf.mxu1 }
 0x1ad   :  { %v2779_v40 = vpop.f32.mrf.mxu1 }
 0x1dc   :  { %v637_v59 = vpop.permute.xlu0 %636 }
 0x1dd   :  { %v3373_v60 = vadd.f32 %v637_v59, %v629_v58 }
 0x1df   :  { %3028 = vtanh.f32 %v3373_v60 }
 0x1ec   :  { %v3029_v1 = vpop.eup %3028 }
 0x1ed   :  { %642 = vrot.lane.b32.xlu1 %v3029_v1, %s3094_s1  ;;  %v3492_v1 = vsel %vm646_vm3, %v3373_v60, 0.0 }
 0x25f   :  { %v643_v32 = vpop.permute.xlu1 %642 }
 0x260   :  { %v645_v34 = vmul.f32 %v3320_v51, %v643_v32 }
 0x262   :  { %v3445_v36 = vsel %vm646_vm3, %v645_v34, 0.0 }
 0x263   :  { %650 = vrot.lane.b32.xlu0 %v3445_v36, %s3095_s25 }
 0x2d5   :  { %v651_v37 = vpop.permute.xlu0 %650 }
 0x2d6   :  { %2800 = vmatmul.mubr.msk.f32.vlgmr.msra.gmra.mxu1 %vm210_vm2, %v651_v37 }
 0x2d7   :  { %2814 = vmatpush3.msra.mxu1 %v3212_v11  ;;  %2821 = vmatprep.mubr.msk.f32.mxu1 %vm3092_vm1, %v3091_v13 }
 0x2d8   :  { %2815 = vmatprep.subr.mxu1 %v3091_v13 }
 0x2d9   :  { %2816 = vmatpush3.msra.mxu1 %v3225_v14 }
 0x2da   :  { %2817 = vmatprep.subr.mxu1 %v3091_v13 }
 0x2db   :  { %2818 = vmatpush3.msra.mxu1 %v3244_v17 }
 0x2dc   :  { %2819 = vmatprep.subr.mxu1 %v3091_v13 }
 0x2dd   :  { %2820 = vmatpush3.msra.mxu1 %v3253_v18 }
 0x2de   :  { %2822 = vmatmul.mubr.msk.f32.vlgmr.msra.gmra.mxu1 %vm210_vm2, %v651_v37  ;;  %2835 = vmatprep.subr.mxu1 %v3091_v13 }
 0x2df   :  { %2836 = vmatpush3.msra.mxu1 %v3379_v61  ;;  %2843 = vmatprep.mubr.msk.f32.mxu1 %vm3092_vm1, %v3091_v13 }
 0x2e0   :  { %2837 = vmatprep.subr.mxu1 %v3091_v13 }
 0x2e1   :  { %2838 = vmatpush3.msra.mxu1 %v3384_v62 }
 0x2e2   :  { %2839 = vmatprep.subr.mxu1 %v3091_v13 }
 0x2e3   :  { %2840 = vmatpush3.msra.mxu1 %v3392_v63 }
 0x2e4   :  { %2841 = vmatprep.subr.mxu1 %v3091_v13 }
 0x2e5   :  { %2842 = vmatpush3.msra.mxu1 %v3401_v0 }
 0x2e6   :  { %2857 = vmatprep.subr.mxu1 %v3091_v13 }
 0x396   :  { %v720_v41 = vpop.f32.mrf.mxu1 }
 0x397   :  { %v721_v42 = vadd.f32 %v720_v41, %v299_v4 }
 0x398   :  { %v2801_v43 = vpop.f32.mrf.mxu1 }
 0x399   :  { %v724_v44 = vmax.f32 %v721_v42, 0.0 }
 0x39b   :  { %2811 = vmatmul.mubr.msk.f32.vlgmr.msra.gmra.mxu0 %vm210_vm2, %v724_v44 }
 0x39c   :  { %2825 = vmatpush3.msra.mxu0 %v3336_v54  ;;  %2832 = vmatprep.mubr.msk.f32.mxu0 %vm3092_vm1, %v3091_v13 }
 0x39d   :  { %2826 = vmatprep.subr.mxu0 %v3091_v13 }
 0x39e   :  { %v894_v45 = vpop.f32.mrf.mxu1  ;;  %2827 = vmatpush3.msra.mxu0 %v3342_v55 }
 0x39f   :  { %v898_v46 = vadd.f32 %v894_v45, %v3293_v26  ;;  %2828 = vmatprep.subr.mxu0 %v3091_v13 }
 0x3a0   :  { %v2823_v47 = vpop.f32.mrf.mxu1  ;;  %2829 = vmatpush3.msra.mxu0 %v3350_v56 }
 0x3a1   :  { %3030 = vtanh.f32 %v898_v46  ;;  %2830 = vmatprep.subr.mxu0 %v3091_v13  ;;  %v2540_v49 = vmul.f32 -1.442695, %v898_v46 }
 0x3a2   :  { %2831 = vmatpush3.msra.mxu0 %v3359_v57 }
 0x3a3   :  { %2846 = vmatprep.subr.mxu0 %v3091_v13  ;;  %3032 = vpow2.f32 %v2540_v49 }
 0x3ae   :  { %v3031_v48 = vpop.eup %3030 }
 0x3af   :  { %908 = vrot.lane.b32.xlu1 %v3031_v48, %s3094_s1 }
 0x3b0   :  { %v3033_v50 = vpop.eup %3032 }
 0x3b1   :  { %v902_v51 = vadd.f32 1.0, %v3033_v50 }
 0x3b3   :  { %3034 = vrcp.f32 %v902_v51 }
 0x3c0   :  { %v3035_v26 = vpop.eup %3034 }
 0x3c1   :  { %v906_v2 = vmul.f32 %v3035_v26, %v3492_v1 }
 0x421   :  { %v909_v52 = vpop.permute.xlu1 %908 }
 0x422   :  { %v911_v53 = vmul.f32 %v3035_v26, %v909_v52 }
 0x424   :  { %913 = vrot.lane.b32.xlu0 %v911_v53, %s3095_s25 }
 0x45b   :  { %v3487_v58 = vpop.f32.mrf.mxu0 }
 0x45d   :  { %v2812_v59 = vpop.f32.mrf.mxu0 }
 0x496   :  { %v914_v3 = vpop.permute.xlu0 %913 }
 0x497   :  { %v3495_v4 = vadd.f32 %v914_v3, %v906_v2 }
 0x499   :  { %3036 = vtanh.f32 %v3495_v4  ;;  %v3556_v45 = vsel %vm923_vm4, %v3495_v4, %v3492_v1 }
 0x4a6   :  { %v3037_v5 = vpop.eup %3036 }
 0x4a7   :  { %919 = vrot.lane.b32.xlu1 %v3037_v5, %s3094_s1 }
 0x519   :  { %v920_v6 = vpop.permute.xlu1 %919 }
 0x51a   :  { %v922_v8 = vmul.f32 %v3035_v26, %v920_v6 }
 0x51c   :  { %v3502_v10 = vsel %vm923_vm4, %v922_v8, 0.0  ;;  %v3507_v60 = vsel %vm923_vm4, %v922_v8, %v3445_v36 }
 0x51d   :  { %928 = vrot.lane.b32.xlu0 %v3502_v10, %s3095_s25  ;;  %1104 = vrot.lane.b32.xlu1 %v3507_v60, %s3095_s25 }
 0x58f   :  { %v929_v15 = vpop.permute.xlu0 %928  ;;  %v1105_v19 = vpop.permute.xlu1 %1104 }
 0x590   :  { %2833 = vmatmul.mubr.msk.f32.vlgmr.msra.gmra.mxu0 %vm210_vm2, %v929_v15 }
 0x591   :  { %2847 = vmatpush3.msra.mxu0 %v3212_v11  ;;  %2854 = vmatprep.mubr.msk.f32.mxu0 %vm3092_vm1, %v3091_v13 }
 0x592   :  { %2848 = vmatprep.subr.mxu0 %v3091_v13 }
 0x593   :  { %2849 = vmatpush3.msra.mxu0 %v3225_v14 }
 0x594   :  { %2850 = vmatprep.subr.mxu0 %v3091_v13 }
 0x595   :  { %2851 = vmatpush3.msra.mxu0 %v3244_v17 }
 0x596   :  { %2852 = vmatprep.subr.mxu0 %v3091_v13 }
 0x597   :  { %2853 = vmatpush3.msra.mxu0 %v3253_v18 }
 0x598   :  { %2855 = vmatmul.mubr.msk.f32.vlgmr.msra.gmra.mxu0 %vm210_vm2, %v1105_v19  ;;  %2868 = vmatprep.subr.mxu0 %v3091_v13 }
 0x599   :  { %2869 = vmatpush3.msra.mxu0 %v3379_v61  ;;  %2876 = vmatprep.mubr.msk.f32.mxu0 %vm3092_vm1, %v3091_v13 }
 0x59a   :  { %2870 = vmatprep.subr.mxu0 %v3091_v13 }
 0x59b   :  { %2871 = vmatpush3.msra.mxu0 %v3384_v62 }
 0x59c   :  { %2872 = vmatprep.subr.mxu0 %v3091_v13 }
 0x59d   :  { %2873 = vmatpush3.msra.mxu0 %v3392_v63 }
 0x59e   :  { %2874 = vmatprep.subr.mxu0 %v3091_v13 }
 0x59f   :  { %2875 = vmatpush3.msra.mxu0 %v3401_v0 }
 0x5a0   :  { %2890 = vmatprep.subr.mxu0 %v3091_v13 }
 0x650   :  { %v998_v20 = vpop.f32.mrf.mxu0 }
 0x651   :  { %v999_v22 = vadd.f32 %v998_v20, %v3418_v9 }
 0x652   :  { %v2834_v24 = vpop.f32.mrf.mxu0 }
 0x653   :  { %v1002_v25 = vmax.f32 %v999_v22, 0.0 }
 0x655   :  { %2844 = vmatmul.mubr.msk.f32.vlgmr.msra.gmra.mxu1 %vm210_vm2, %v1002_v25 }
 0x656   :  { %2858 = vmatpush3.msra.mxu1 %v3336_v54  ;;  %2865 = vmatprep.mubr.msk.f32.mxu1 %vm3092_vm1, %v3091_v13 }
 0x657   :  { %2859 = vmatprep.subr.mxu1 %v3091_v13 }
 0x658   :  { %v1174_v27 = vpop.f32.mrf.mxu0  ;;  %2860 = vmatpush3.msra.mxu1 %v3342_v55 }
 0x659   :  { %v1178_v28 = vadd.f32 %v1174_v27, %v3297_v31  ;;  %2861 = vmatprep.subr.mxu1 %v3091_v13 }
 0x65a   :  { %v2856_v32 = vpop.f32.mrf.mxu0  ;;  %2862 = vmatpush3.msra.mxu1 %v3350_v56 }
 0x65b   :  { %3038 = vtanh.f32 %v1178_v28  ;;  %2863 = vmatprep.subr.mxu1 %v3091_v13  ;;  %v2544_v34 = vmul.f32 -1.442695, %v1178_v28 }
 0x65c   :  { %2864 = vmatpush3.msra.mxu1 %v3359_v57 }
 0x65d   :  { %2879 = vmatprep.subr.mxu1 %v3091_v13  ;;  %3040 = vpow2.f32 %v2544_v34 }
 0x668   :  { %v3039_v9 = vpop.eup %3038 }
 0x669   :  { %1188 = vrot.lane.b32.xlu0 %v3039_v9, %s3094_s1 }
 0x66a   :  { %v3041_v37 = vpop.eup %3040 }
 0x66b   :  { %v1182_v40 = vadd.f32 1.0, %v3041_v37 }
 0x66d   :  { %3042 = vrcp.f32 %v1182_v40 }
 0x67a   :  { %v3043_v31 = vpop.eup %3042 }
 0x67b   :  { %v1186_v46 = vmul.f32 %v3043_v31, %v3556_v45 }
 0x6db   :  { %v1189_v41 = vpop.permute.xlu0 %1188 }
 0x6dc   :  { %v1191_v42 = vmul.f32 %v3043_v31, %v1189_v41 }
 0x6de   :  { %1193 = vrot.lane.b32.xlu1 %v1191_v42, %s3095_s25 }
 0x715   :  { %v3550_v43 = vpop.f32.mrf.mxu1 }
 0x717   :  { %v2845_v44 = vpop.f32.mrf.mxu1 }
 0x750   :  { %v1194_v47 = vpop.permute.xlu1 %1193 }
 0x751   :  { %v3559_v48 = vadd.f32 %v1194_v47, %v1186_v46 }
 0x753   :  { %3044 = vtanh.f32 %v3559_v48  ;;  %v3620_v27 = vsel %vm1203_vm5, %v3559_v48, %v3556_v45 }
 0x760   :  { %v3045_v49 = vpop.eup %3044 }
 0x761   :  { %1199 = vrot.lane.b32.xlu0 %v3045_v49, %s3094_s1 }
 0x7d3   :  { %v1200_v50 = vpop.permute.xlu0 %1199 }
 0x7d4   :  { %v1202_v51 = vmul.f32 %v3043_v31, %v1200_v50 }
 0x7d6   :  { %v3566_v26 = vsel %vm1203_vm5, %v1202_v51, 0.0  ;;  %v3571_v52 = vsel %vm1203_vm5, %v1202_v51, %v3507_v60 }
 0x7d7   :  { %1208 = vrot.lane.b32.xlu1 %v3566_v26, %s3095_s25  ;;  %1384 = vrot.lane.b32.xlu0 %v3571_v52, %s3095_s25 }
 0x849   :  { %v1209_v53 = vpop.permute.xlu1 %1208  ;;  %v1385_v59 = vpop.permute.xlu0 %1384 }
 0x84a   :  { %2866 = vmatmul.mubr.msk.f32.vlgmr.msra.gmra.mxu1 %vm210_vm2, %v1209_v53 }
 0x84b   :  { %2880 = vmatpush3.msra.mxu1 %v3212_v11  ;;  %2887 = vmatprep.mubr.msk.f32.mxu1 %vm3092_vm1, %v3091_v13 }
 0x84c   :  { %2881 = vmatprep.subr.mxu1 %v3091_v13 }
 0x84d   :  { %2882 = vmatpush3.msra.mxu1 %v3225_v14 }
 0x84e   :  { %2883 = vmatprep.subr.mxu1 %v3091_v13 }
 0x84f   :  { %2884 = vmatpush3.msra.mxu1 %v3244_v17 }
 0x850   :  { %2885 = vmatprep.subr.mxu1 %v3091_v13 }
 0x851   :  { %2886 = vmatpush3.msra.mxu1 %v3253_v18 }
 0x852   :  { %2888 = vmatmul.mubr.msk.f32.vlgmr.msra.gmra.mxu1 %vm210_vm2, %v1385_v59  ;;  %2901 = vmatprep.subr.mxu1 %v3091_v13 }
 0x853   :  { %2902 = vmatpush3.msra.mxu1 %v3379_v61  ;;  %2909 = vmatprep.mubr.msk.f32.mxu1 %vm3092_vm1, %v3091_v13 }
 0x854   :  { %2903 = vmatprep.subr.mxu1 %v3091_v13 }
 0x855   :  { %2904 = vmatpush3.msra.mxu1 %v3384_v62 }
 0x856   :  { %2905 = vmatprep.subr.mxu1 %v3091_v13 }
 0x857   :  { %2906 = vmatpush3.msra.mxu1 %v3392_v63 }
 0x858   :  { %2907 = vmatprep.subr.mxu1 %v3091_v13 }
 0x859   :  { %2908 = vmatpush3.msra.mxu1 %v3401_v0 }
 0x85a   :  { %2923 = vmatprep.subr.mxu1 %v3091_v13 }
 0x90a   :  { %v1278_v1 = vpop.f32.mrf.mxu1 }
 0x90b   :  { %v1279_v2 = vadd.f32 %v1278_v1, %v3416_v7 }
 0x90c   :  { %v2867_v3 = vpop.f32.mrf.mxu1 }
 0x90d   :  { %v1282_v4 = vmax.f32 %v1279_v2, 0.0 }
 0x90f   :  { %2877 = vmatmul.mubr.msk.f32.vlgmr.msra.gmra.mxu0 %vm210_vm2, %v1282_v4 }
 0x910   :  { %2891 = vmatpush3.msra.mxu0 %v3336_v54  ;;  %2898 = vmatprep.mubr.msk.f32.mxu0 %vm3092_vm1, %v3091_v13 }
 0x911   :  { %2892 = vmatprep.subr.mxu0 %v3091_v13 }
 0x912   :  { %v1454_v5 = vpop.f32.mrf.mxu1  ;;  %2893 = vmatpush3.msra.mxu0 %v3342_v55 }
 0x913   :  { %v1458_v6 = vadd.f32 %v1454_v5, %v3295_v29  ;;  %2894 = vmatprep.subr.mxu0 %v3091_v13 }
 0x914   :  { %v2889_v8 = vpop.f32.mrf.mxu1  ;;  %2895 = vmatpush3.msra.mxu0 %v3350_v56 }
 0x915   :  { %3046 = vtanh.f32 %v1458_v6  ;;  %2896 = vmatprep.subr.mxu0 %v3091_v13  ;;  %v2548_v60 = vmul.f32 -1.442695, %v1458_v6 }
 0x916   :  { %2897 = vmatpush3.msra.mxu0 %v3359_v57 }
 0x917   :  { %2912 = vmatprep.subr.mxu0 %v3091_v13  ;;  %3048 = vpow2.f32 %v2548_v60 }
 0x922   :  { %v3047_v7 = vpop.eup %3046 }
 0x923   :  { %1468 = vrot.lane.b32.xlu1 %v3047_v7, %s3094_s1 }
 0x924   :  { %v3049_v15 = vpop.eup %3048 }
 0x925   :  { %v1462_v19 = vadd.f32 1.0, %v3049_v15 }
 0x927   :  { %3050 = vrcp.f32 %v1462_v19 }
 0x934   :  { %v3051_v29 = vpop.eup %3050 }
 0x935   :  { %v1466_v28 = vmul.f32 %v3051_v29, %v3620_v27 }
 0x995   :  { %v1469_v20 = vpop.permute.xlu1 %1468 }
 0x996   :  { %v1471_v22 = vmul.f32 %v3051_v29, %v1469_v20 }
 0x998   :  { %1473 = vrot.lane.b32.xlu0 %v1471_v22, %s3095_s25 }
 0x9cf   :  { %v3614_v24 = vpop.f32.mrf.mxu0 }
 0x9d1   :  { %v2878_v25 = vpop.f32.mrf.mxu0 }
 0xa0a   :  { %v1474_v32 = vpop.permute.xlu0 %1473 }
 0xa0b   :  { %v3623_v9 = vadd.f32 %v1474_v32, %v1466_v28 }
 0xa0d   :  { %3052 = vtanh.f32 %v3623_v9  ;;  %v3684_v5 = vsel %vm1483_vm6, %v3623_v9, %v3620_v27 }
 0xa1a   :  { %v3053_v34 = vpop.eup %3052 }
 0xa1b   :  { %1479 = vrot.lane.b32.xlu1 %v3053_v34, %s3094_s1 }
 0xa8d   :  { %v1480_v37 = vpop.permute.xlu1 %1479 }
 0xa8e   :  { %v1482_v40 = vmul.f32 %v3051_v29, %v1480_v37 }
 0xa90   :  { %v3630_v31 = vsel %vm1483_vm6, %v1482_v40, 0.0  ;;  %v3635_v41 = vsel %vm1483_vm6, %v1482_v40, %v3571_v52 }
 0xa91   :  { %1488 = vrot.lane.b32.xlu0 %v3630_v31, %s3095_s25  ;;  %1664 = vrot.lane.b32.xlu1 %v3635_v41, %s3095_s25 }
 0xb03   :  { %v1489_v42 = vpop.permute.xlu0 %1488  ;;  %v1665_v44 = vpop.permute.xlu1 %1664 }
 0xb04   :  { %2899 = vmatmul.mubr.msk.f32.vlgmr.msra.gmra.mxu0 %vm210_vm2, %v1489_v42 }
 0xb05   :  { %2913 = vmatpush3.msra.mxu0 %v3212_v11  ;;  %2920 = vmatprep.mubr.msk.f32.mxu0 %vm3092_vm1, %v3091_v13 }
 0xb06   :  { %2914 = vmatprep.subr.mxu0 %v3091_v13 }
 0xb07   :  { %2915 = vmatpush3.msra.mxu0 %v3225_v14 }
 0xb08   :  { %2916 = vmatprep.subr.mxu0 %v3091_v13 }
 0xb09   :  { %2917 = vmatpush3.msra.mxu0 %v3244_v17 }
 0xb0a   :  { %2918 = vmatprep.subr.mxu0 %v3091_v13 }
 0xb0b   :  { %2919 = vmatpush3.msra.mxu0 %v3253_v18 }
 0xb0c   :  { %2921 = vmatmul.mubr.msk.f32.vlgmr.msra.gmra.mxu0 %vm210_vm2, %v1665_v44  ;;  %2934 = vmatprep.subr.mxu0 %v3091_v13 }
 0xb0d   :  { %2935 = vmatpush3.msra.mxu0 %v3379_v61  ;;  %2942 = vmatprep.mubr.msk.f32.mxu0 %vm3092_vm1, %v3091_v13 }
 0xb0e   :  { %2936 = vmatprep.subr.mxu0 %v3091_v13 }
 0xb0f   :  { %2937 = vmatpush3.msra.mxu0 %v3384_v62 }
 0xb10   :  { %2938 = vmatprep.subr.mxu0 %v3091_v13 }
 0xb11   :  { %2939 = vmatpush3.msra.mxu0 %v3392_v63 }
 0xb12   :  { %2940 = vmatprep.subr.mxu0 %v3091_v13 }
 0xb13   :  { %2941 = vmatpush3.msra.mxu0 %v3401_v0 }
 0xb14   :  { %2956 = vmatprep.subr.mxu0 %v3091_v13 }
 0xbc4   :  { %v1558_v45 = vpop.f32.mrf.mxu0 }
 0xbc5   :  { %v1559_v46 = vadd.f32 %v1558_v45, %v3422_v16 }
 0xbc6   :  { %v2900_v47 = vpop.f32.mrf.mxu0 }
 0xbc7   :  { %v1562_v48 = vmax.f32 %v1559_v46, 0.0 }
 0xbc9   :  { %2910 = vmatmul.mubr.msk.f32.vlgmr.msra.gmra.mxu1 %vm210_vm2, %v1562_v48 }
 0xbca   :  { %2924 = vmatpush3.msra.mxu1 %v3336_v54  ;;  %2931 = vmatprep.mubr.msk.f32.mxu1 %vm3092_vm1, %v3091_v13 }
 0xbcb   :  { %2925 = vmatprep.subr.mxu1 %v3091_v13 }
 0xbcc   :  { %v1734_v49 = vpop.f32.mrf.mxu0  ;;  %2926 = vmatpush3.msra.mxu1 %v3342_v55 }
 0xbcd   :  { %v1738_v50 = vadd.f32 %v1734_v49, %v3301_v35  ;;  %2927 = vmatprep.subr.mxu1 %v3091_v13 }
 0xbce   :  { %v2922_v51 = vpop.f32.mrf.mxu0  ;;  %2928 = vmatpush3.msra.mxu1 %v3350_v56 }
 0xbcf   :  { %3054 = vtanh.f32 %v1738_v50  ;;  %2929 = vmatprep.subr.mxu1 %v3091_v13  ;;  %v2552_v52 = vmul.f32 -1.442695, %v1738_v50 }
 0xbd0   :  { %2930 = vmatpush3.msra.mxu1 %v3359_v57 }
 0xbd1   :  { %2945 = vmatprep.subr.mxu1 %v3091_v13  ;;  %3056 = vpow2.f32 %v2552_v52 }
 0xbdc   :  { %v3055_v16 = vpop.eup %3054 }
 0xbdd   :  { %1748 = vrot.lane.b32.xlu0 %v3055_v16, %s3094_s1 }
 0xbde   :  { %v3057_v53 = vpop.eup %3056 }
 0xbdf   :  { %v1742_v59 = vadd.f32 1.0, %v3057_v53 }
 0xbe1   :  { %3058 = vrcp.f32 %v1742_v59 }
 0xbee   :  { %v3059_v35 = vpop.eup %3058 }
 0xbef   :  { %v1746_v6 = vmul.f32 %v3059_v35, %v3684_v5 }
 0xc4f   :  { %v1749_v1 = vpop.permute.xlu0 %1748 }
 0xc50   :  { %v1751_v2 = vmul.f32 %v3059_v35, %v1749_v1 }
 0xc52   :  { %1753 = vrot.lane.b32.xlu1 %v1751_v2, %s3095_s25  ;;  %v3082_v2 = vld [vmem:[%s3935_s3 + $0x18] sm:$0xff] }
 0xc89   :  { %v3678_v3 = vpop.f32.mrf.mxu1 }
 0xc8b   :  { %v2911_v4 = vpop.f32.mrf.mxu1 }
 0xcc4   :  { %v1754_v8 = vpop.permute.xlu1 %1753 }
 0xcc5   :  { %v3687_v7 = vadd.f32 %v1754_v8, %v1746_v6 }
 0xcc7   :  { %3060 = vtanh.f32 %v3687_v7  ;;  %v3748_v48 = vsel %vm1763_vm7, %v3687_v7, %v3684_v5 }
 0xcd4   :  { %v3061_v60 = vpop.eup %3060 }
 0xcd5   :  { %1759 = vrot.lane.b32.xlu0 %v3061_v60, %s3094_s1 }
 0xd47   :  { %v1760_v15 = vpop.permute.xlu0 %1759 }
 0xd48   :  { %v1762_v19 = vmul.f32 %v3059_v35, %v1760_v15 }
 0xd4a   :  { %v3694_v29 = vsel %vm1763_vm7, %v1762_v19, 0.0  ;;  %v3699_v20 = vsel %vm1763_vm7, %v1762_v19, %v3635_v41 }
 0xd4b   :  { %1768 = vrot.lane.b32.xlu1 %v3694_v29, %s3095_s25  ;;  %1944 = vrot.lane.b32.xlu0 %v3699_v20, %s3095_s25 }
 0xdbd   :  { %v1769_v22 = vpop.permute.xlu1 %1768  ;;  %v1945_v25 = vpop.permute.xlu0 %1944 }
 0xdbe   :  { %2932 = vmatmul.mubr.msk.f32.vlgmr.msra.gmra.mxu1 %vm210_vm2, %v1769_v22  ;;  %v3816_v22 = vld [vmem:[%s3943_s9] ss:$0 sm:$0xff] }
 0xdbf   :  { %2946 = vmatpush3.msra.mxu1 %v3212_v11  ;;  %2953 = vmatprep.mubr.msk.f32.mxu1 %vm3092_vm1, %v3091_v13 }
 0xdc0   :  { %2947 = vmatprep.subr.mxu1 %v3091_v13 }
 0xdc1   :  { %2948 = vmatpush3.msra.mxu1 %v3225_v14 }
 0xdc2   :  { %2949 = vmatprep.subr.mxu1 %v3091_v13 }
 0xdc3   :  { %2950 = vmatpush3.msra.mxu1 %v3244_v17 }
 0xdc4   :  { %2951 = vmatprep.subr.mxu1 %v3091_v13 }
 0xdc5   :  { %2952 = vmatpush3.msra.mxu1 %v3253_v18 }
 0xdc6   :  { %2954 = vmatmul.mubr.msk.f32.vlgmr.msra.gmra.mxu1 %vm210_vm2, %v1945_v25  ;;  %2967 = vmatprep.subr.mxu1 %v3091_v13  ;;  %v504_v25 = vadd.f32 %v3816_v22, %v3471_v38  ;;  %v3083_v38 = vld [vmem:[%s3934_s0] sm:$0xff] }
 0xdc7   :  { %2968 = vmatpush3.msra.mxu1 %v3379_v61  ;;  %2975 = vmatprep.mubr.msk.f32.mxu1 %vm3092_vm1, %v3091_v13 }
 0xdc8   :  { %2969 = vmatprep.subr.mxu1 %v3091_v13 }
 0xdc9   :  { %2970 = vmatpush3.msra.mxu1 %v3384_v62 }
 0xdca   :  { %2971 = vmatprep.subr.mxu1 %v3091_v13 }
 0xdcb   :  { %2972 = vmatpush3.msra.mxu1 %v3392_v63 }
 0xdcc   :  { %2973 = vmatprep.subr.mxu1 %v3091_v13 }
 0xdcd   :  { %2974 = vmatpush3.msra.mxu1 %v3401_v0 }
 0xdce   :  { %2989 = vmatprep.subr.mxu1 %v3091_v13 }
 0xe7e   :  { %v1838_v11 = vpop.f32.mrf.mxu1 }
 0xe7f   :  { %v1839_v27 = vadd.f32 %v1838_v11, %v3420_v12 }
 0xe80   :  { %v2933_v28 = vpop.f32.mrf.mxu1 }
 0xe81   :  { %v1842_v32 = vmax.f32 %v1839_v27, 0.0  ;;  %v507_v28 = vmax.f32 %v504_v25, 0.0 }
 0xe83   :  { %2943 = vmatmul.mubr.msk.f32.vlgmr.msra.gmra.mxu0 %vm210_vm2, %v1842_v32  ;;  %v3824_v32 = vld [vmem:[%s3944_s11] ss:$0 sm:$0xff]  ;;  %s3097_s11 = smov 88  }
 0xe84   :  { %2957 = vmatpush3.msra.mxu0 %v3336_v54  ;;  %2964 = vmatprep.mubr.msk.f32.mxu0 %vm3092_vm1, %v3091_v13 }
 0xe85   :  { %2958 = vmatprep.subr.mxu0 %v3091_v13 }
 0xe86   :  { %v2014_v9 = vpop.f32.mrf.mxu1  ;;  %2959 = vmatpush3.msra.mxu0 %v3342_v55 }
 0xe87   :  { %v2018_v34 = vadd.f32 %v2014_v9, %v3299_v33  ;;  %2960 = vmatprep.subr.mxu0 %v3091_v13 }
 0xe88   :  { %v2955_v37 = vpop.f32.mrf.mxu1  ;;  %2961 = vmatpush3.msra.mxu0 %v3350_v56 }
 0xe89   :  { %3062 = vtanh.f32 %v2018_v34  ;;  %2962 = vmatprep.subr.mxu0 %v3091_v13  ;;  %v2556_v40 = vmul.f32 -1.442695, %v2018_v34  ;;  %v524_v34 = vmul.f32 %v3824_v32, %v507_v28  ;;  %v508_v37 = vmul.f32 0.0, %v3083_v38 }
 0xe8a   :  { %2963 = vmatpush3.msra.mxu0 %v3359_v57 }
 0xe8b   :  { %2978 = vmatprep.subr.mxu0 %v3091_v13  ;;  %3064 = vpow2.f32 %v2556_v40 }
 0xe96   :  { %v3063_v12 = vpop.eup %3062 }
 0xe97   :  { %2028 = vrot.lane.b32.xlu1 %v3063_v12, %s3094_s1 }
 0xe98   :  { %v3065_v41 = vpop.eup %3064 }
 0xe99   :  { %v2022_v42 = vadd.f32 1.0, %v3065_v41 }
 0xe9b   :  { %3066 = vrcp.f32 %v2022_v42 }
 0xea8   :  { %v3067_v33 = vpop.eup %3066 }
 0xea9   :  { %v2026_v49 = vmul.f32 %v3067_v33, %v3748_v48 }
 0xf09   :  { %v2029_v44 = vpop.permute.xlu1 %2028 }
 0xf0a   :  { %v2031_v45 = vmul.f32 %v3067_v33, %v2029_v44  ;;  %v3084_v44 = vld [vmem:[%s3934_s0 + $0x8] sm:$0xff] }
 0xf0c   :  { %2033 = vrot.lane.b32.xlu0 %v2031_v45, %s3095_s25 }
 0xf43   :  { %v3742_v46 = vpop.f32.mrf.mxu0 }
 0xf45   :  { %v2944_v47 = vpop.f32.mrf.mxu0 }
 0xf7e   :  { %v2034_v50 = vpop.permute.xlu0 %2033 }
 0xf7f   :  { %v3751_v51 = vadd.f32 %v2034_v50, %v2026_v49 }
 0xf81   :  { %3068 = vtanh.f32 %v3751_v51 }
 0xf8e   :  { %v3069_v16 = vpop.eup %3068 }
 0xf8f   :  { %2039 = vrot.lane.b32.xlu1 %v3069_v16, %s3094_s1 }
0x1001   :  { %v2040_v52 = vpop.permute.xlu1 %2039 }
0x1002   :  { %v2042_v53 = vmul.f32 %v3067_v33, %v2040_v52  ;;  %v795_v33 = vadd.f32 %v3816_v22, %v3487_v58  ;;  %v18_v58 = vstv %s3945_s12 }
0x1003   :  { %19 = vst [vmem:[#allocation2] sm:$0x1] %v18_v58 }
0x1004   :  { %v3758_v59 = vsel %vm2043_vm8, %v2042_v53, 0.0  ;;  %v2044_v35 = vsel %vm2043_vm8, %v2042_v53, %v3699_v20  ;;  %v2533_v20 = vld [vmem:[%s3942_s10] ss:$0 sm:$0xff]  ;;  %v798_v45 = vmax.f32 %v795_v33, 0.0 }
0x1005   :  { %2048 = vrot.lane.b32.xlu0 %v3758_v59, %s3095_s25  ;;  %2224 = vrot.lane.b32.xlu1 %v2044_v35, %s3095_s25 }
0x1006   :  { %v807_v47 = vmul.f32 %v3824_v32, %v798_v45 }
0x1077   :  { %v2049_v1 = vpop.permute.xlu0 %2048  ;;  %v2225_v4 = vpop.permute.xlu1 %2224 }
0x1078   :  { %2965 = vmatmul.mubr.msk.f32.vlgmr.msra.gmra.mxu0 %vm210_vm2, %v2049_v1  ;;  %v3085_v1 = vld [vmem:[%s3934_s0 + $0x10] sm:$0xff] }
0x1079   :  { %2979 = vmatpush3.msra.mxu0 %v3082_v2  ;;  %2986 = vmatprep.mubr.msk.f32.mxu0 %vm3092_vm1, %v3091_v13  ;;  %v1073_v2 = vadd.f32 %v3816_v22, %v3550_v43 }
0x107a   :  { %2980 = vmatprep.subr.mxu0 %v3091_v13 }
0x107b   :  { %2981 = vmatpush3.msra.mxu0 %v3225_v14 }
0x107c   :  { %2982 = vmatprep.subr.mxu0 %v3091_v13 }
0x107d   :  { %2983 = vmatpush3.msra.mxu0 %v3244_v17 }
0x107e   :  { %2984 = vmatprep.subr.mxu0 %v3091_v13 }
0x107f   :  { %2985 = vmatpush3.msra.mxu0 %v3253_v18 }
0x1080   :  { %2987 = vmatmul.mubr.msk.f32.vlgmr.msra.gmra.mxu0 %vm210_vm2, %v2225_v4  ;;  %3000 = vmatprep.subr.mxu0 %v3091_v13  ;;  %v3086_v4 = vld [vmem:[%s3934_s0 + $0x18] sm:$0xff] }
0x1081   :  { %3001 = vmatpush3.msra.mxu0 %v3379_v61  ;;  %3008 = vmatprep.mubr.msk.f32.mxu0 %vm3092_vm1, %v3091_v13 }
0x1082   :  { %3002 = vmatprep.subr.mxu0 %v3091_v13 }
0x1083   :  { %3003 = vmatpush3.msra.mxu0 %v3384_v62 }
0x1084   :  { %3004 = vmatprep.subr.mxu0 %v3091_v13 }
0x1085   :  { %3005 = vmatpush3.msra.mxu0 %v3392_v63 }
0x1086   :  { %3006 = vmatprep.subr.mxu0 %v3091_v13 }
0x1087   :  { %3007 = vmatpush3.msra.mxu0 %v3401_v0 }
0x1138   :  { %v2118_v14 = vpop.f32.mrf.mxu0 }
0x1139   :  { %v2119_v17 = vadd.f32 %v2118_v14, %v3426_v23  ;;  %v3087_v14 = vld [vmem:[%s3934_s0 + $0x20] sm:$0xff] }
0x113a   :  { %v2966_v18 = vpop.f32.mrf.mxu0 }
0x113b   :  { %v2122_v61 = vmax.f32 %v2119_v17, 0.0  ;;  %v1353_v18 = vadd.f32 %v3816_v22, %v3614_v24 }
0x113d   :  { %2976 = vmatmul.mubr.msk.f32.vlgmr.msra.gmra.mxu1 %vm210_vm2, %v2122_v61  ;;  %v1356_v43 = vmax.f32 %v1353_v18, 0.0  ;;  %v3088_v61 = vld [vmem:[%s3934_s0 + $0x30] sm:$0xff] }
0x113e   :  { %2990 = vmatpush3.msra.mxu1 %v3336_v54  ;;  %2997 = vmatprep.mubr.msk.f32.mxu1 %vm3092_vm1, %v3091_v13 }
0x113f   :  { %2991 = vmatprep.subr.mxu1 %v3091_v13 }
0x1140   :  { %v2294_v62 = vpop.f32.mrf.mxu0  ;;  %2992 = vmatpush3.msra.mxu1 %v3342_v55 }
0x1141   :  { %v2298_v63 = vadd.f32 %v2294_v62, %v3303_v39  ;;  %2993 = vmatprep.subr.mxu1 %v3091_v13  ;;  %v1362_v62 = vmul.f32 %v3824_v32, %v1356_v43  ;;  %v2535_v43 = vld [vmem:[#allocation2] ss:$0 sm:$0xff] }
0x1142   :  { %v2988_v0 = vpop.f32.mrf.mxu0  ;;  %2994 = vmatpush3.msra.mxu1 %v3350_v56 }
0x1143   :  { %3070 = vtanh.f32 %v2298_v63  ;;  %2995 = vmatprep.subr.mxu1 %v3091_v13  ;;  %v2560_v23 = vmul.f32 -1.442695, %v2298_v63  ;;  %v2045_v13 = vsel %vm2043_vm8, %v3751_v51, %v3748_v48  ;;  %v1633_v63 = vadd.f32 %v3816_v22, %v3678_v3 }
0x1144   :  { %2996 = vmatpush3.msra.mxu1 %v3359_v57 }
0x1145   :  { %3072 = vpow2.f32 %v2560_v23  ;;  %v1636_v0 = vmax.f32 %v1633_v63, 0.0 }
0x1147   :  { %v1642_v23 = vmul.f32 %v3824_v32, %v1636_v0 }
0x1150   :  { %v3071_v54 = vpop.eup %3070 }
0x1151   :  { %2308 = vrot.lane.b32.xlu0 %v3071_v54, %s3094_s1  ;;  %v3089_v54 = vld [vmem:[%s3934_s0 + $0x38] sm:$0xff] }
0x1152   :  { %v3073_v5 = vpop.eup %3072 }
0x1153   :  { %v2302_v6 = vadd.f32 1.0, %v3073_v5 }
0x1155   :  { %3074 = vrcp.f32 %v2302_v6 }
0x1162   :  { %v3075_v55 = vpop.eup %3074 }
0x1163   :  { %v2306_v57 = vmul.f32 %v3075_v55, %v2045_v13  ;;  %v1913_v13 = vadd.f32 %v3816_v22, %v3742_v46 }
0x11c3   :  { %v2309_v39 = vpop.permute.xlu0 %2308 }
0x11c4   :  { %v2311_v8 = vmul.f32 %v3075_v55, %v2309_v39 }
0x11c6   :  { %2313 = vrot.lane.b32.xlu1 %v2311_v8, %s3095_s25 }
0x11fd   :  { %v3803_v7 = vpop.f32.mrf.mxu1 }
0x11fe   :  { %v2193_v24 = vadd.f32 %v3816_v22, %v3803_v7 }
0x11ff   :  { %v2977_v56 = vpop.f32.mrf.mxu1 }
0x1200   :  { %v2196_v5 = vmax.f32 %v2193_v24, 0.0 }
0x1202   :  { %v2202_v6 = vmul.f32 %v3824_v32, %v2196_v5 }
0x1238   :  { %v2314_v60 = vpop.permute.xlu1 %2313 }
0x1239   :  { %v2316_v15 = vadd.f32 %v2314_v60, %v2306_v57  ;;  %v1916_v57 = vmax.f32 %v1913_v13, 0.0  ;;  %v3090_v60 = vld [vmem:[%s3934_s0 + $0x28] sm:$0xff] }
0x123b   :  { %3076 = vtanh.f32 %v2316_v15 }
0x1248   :  { %v3077_v19 = vpop.eup %3076 }
0x1249   :  { %2319 = vrot.lane.b32.xlu0 %v3077_v19, %s3094_s1 }
0x124d   :  { %514 = vrot.lane.b32.xlu0 %v2533_v20, %s3096_s24 }
0x12bb   :  { %v2320_v11 = vpop.permute.xlu0 %2319 }
0x12bc   :  { %v2322_v27 = vmul.f32 %v3075_v55, %v2320_v11 }
0x12be   :  { %v3826_v9 = vsel %vm2323_vm9, %v2322_v27, 0.0 }
0x12bf   :  { %2326 = vrot.lane.b32.xlu1 %v3826_v9, %s3095_s25  ;;  %v515_v12 = vpop.permute.xlu0 %514 }
0x12c0   :  { %v517_v40 = vmul.f32 %v515_v12, %v508_v37 }
0x12c3   :  { %526 = vrot.lane.b32.xlu1 %v524_v34, %s3096_s24 }
0x1331   :  { %v2327_v30 = vpop.permute.xlu1 %2326 }
0x1332   :  { %2998 = vmatmul.mubr.msk.f32.vlgmr.msra.gmra.mxu1 %vm210_vm2, %v2327_v30 }
0x1335   :  { %v527_v41 = vpop.permute.xlu1 %526 }
0x1336   :  { %v529_v42 = vadd.f32 %v527_v41, %v517_v40 }
0x1338   :  { %531 = vrot.lane.b32.xlu0 %v529_v42, %s3097_s11 }
0x133c   :  { %799 = vrot.lane.b32.xlu0 %v3084_v44, %s3098_s30 }
0x1340   :  { %803 = vrot.lane.b32.xlu0 %v2533_v20, %s3099_s14 }
0x1344   :  { %809 = vrot.lane.b32.xlu0 %v807_v47, %s3099_s14 }
0x13aa   :  { %v532_v48 = vpop.permute.xlu0 %531 }
0x13ab   :  { %v534_v49 = vsel %vm210_vm2, %v532_v48, 0.0 }
0x13ac   :  { %535 = vadd.xlane.f32.xlu1 %v534_v49 }
0x13ae   :  { %v800_v50 = vpop.permute.xlu0 %799 }
0x13af   :  { %v802_v16 = vmul.f32 %v800_v50, %v3445_v36  ;;  %v1076_v36 = vmax.f32 %v1073_v2, 0.0 }
0x13b1   :  { %v1082_v17 = vmul.f32 %v3824_v32, %v1076_v36 }
0x13b2   :  { %v3848_v51 = vpop.permute.xlu0 %803 }
0x13b3   :  { %v806_v52 = vmul.f32 %v3848_v51, %v802_v16 }
0x13b6   :  { %v810_v53 = vpop.permute.xlu0 %809 }
0x13b7   :  { %v812_v35 = vadd.f32 %v810_v53, %v806_v52 }
0x13b9   :  { %814 = vrot.lane.b32.xlu0 %v812_v35, %s3095_s25 }
0x13bd   :  { %1077 = vrot.lane.b32.xlu1 %v3085_v1, %s3098_s30 }
0x13c1   :  { %1357 = vrot.lane.b32.xlu1 %v3086_v4, %s3098_s30 }
0x13c5   :  { %1637 = vrot.lane.b32.xlu1 %v3087_v14, %s3098_s30 }
0x13c9   :  { %1084 = vrot.lane.b32.xlu1 %v1082_v17, %s3099_s14 }
0x13cd   :  { %2197 = vrot.lane.b32.xlu1 %v3088_v61, %s3098_s30 }
0x13d1   :  { %1364 = vrot.lane.b32.xlu1 %v1362_v62, %s3099_s14 }
0x13d5   :  { %2475 = vrot.lane.b32.xlu1 %v3089_v54, %s3098_s30 }
0x13d9   :  { %1644 = vrot.lane.b32.xlu1 %v1642_v23, %s3099_s14 }
0x13dd   :  { %2204 = vrot.lane.b32.xlu1 %v2202_v6, %s3099_s14 }
0x13f2   :  { %v2396_v3 = vpop.f32.mrf.mxu1 }
0x13f3   :  { %v2397_v55 = vadd.f32 %v2396_v3, %v3424_v21  ;;  %v1922_v21 = vmul.f32 %v3824_v32, %v1916_v57 }
0x13f4   :  { %v2999_v39 = vpop.f32.mrf.mxu1 }
0x13f5   :  { %v2400_v8 = vmax.f32 %v2397_v55, 0.0 }
0x13f7   :  { %3009 = vmatmul.mubr.msk.f32.vlgmr.msra.gmra.mxu0 %vm210_vm2, %v2400_v8 }
0x142b   :  { %v815_v7 = vpop.permute.xlu0 %814 }
0x142c   :  { %v817_v56 = vsel %vm210_vm2, %v815_v7, 0.0 }
0x142d   :  { %818 = vadd.xlane.f32.xlu0 %v817_v56 }
0x1435   :  { %v3900_v15 = vpop.xlane.xlu1 %535 }
0x1436   :  { %v543_v23 = vadd.f32 %v2535_v43, %v3900_v15  ;;  %v352_v15 = vlaneseq }
0x1439   :  { %v1078_v19 = vpop.permute.xlu1 %1077 }
0x143a   :  { %v1080_v37 = vmul.f32 %v1078_v19, %v3502_v10 }
0x143c   :  { %v1081_v42 = vmul.f32 %v1080_v37, %v3848_v51 }
0x143d   :  { %v1358_v20 = vpop.permute.xlu1 %1357 }
0x143e   :  { %v1360_v41 = vmul.f32 %v1358_v20, %v3566_v26  ;;  %v353_v20 = vand.u32 127, %v352_v15 }
0x1440   :  { %vm544_vm10 = vcmp.eq.s32.totalorder %v353_v20, 0  ;;  %vm821_vm11 = vcmp.eq.s32.totalorder %v353_v20, 1  ;;  %vm1096_vm12 = vcmp.eq.s32.totalorder %v353_v20, 2  ;;  %vm1376_vm13 = vcmp.eq.s32.totalorder %v353_v20, 3 }
0x1441   :  { %v1638_v25 = vpop.permute.xlu1 %1637  ;;  %vm1656_vm14 = vcmp.eq.s32.totalorder %v353_v20, 4  ;;  %vm1936_vm15 = vcmp.eq.s32.totalorder %v353_v20, 5  ;;  %vm2216_vm0 = vcmp.eq.s32.totalorder %v353_v20, 6  ;;  %vm2494_vm1 = vcmp.eq.s32.totalorder %v353_v20, 7 }
0x1442   :  { %v1640_v47 = vmul.f32 %v1638_v25, %v3630_v31 }
0x1443   :  { %1917 = vrot.lane.b32.xlu0 %v3090_v60, %s3098_s30 }
0x1445   :  { %v1085_v11 = vpop.permute.xlu1 %1084 }
0x1446   :  { %v1087_v44 = vadd.f32 %v1085_v11, %v1081_v42 }
0x1447   :  { %1924 = vrot.lane.b32.xlu0 %v1922_v21, %s3099_s14 }
0x1449   :  { %v2198_v27 = vpop.permute.xlu1 %2197 }
0x144a   :  { %v2200_v16 = vmul.f32 %v2198_v27, %v3758_v59 }
0x144c   :  { %v2201_v53 = vmul.f32 %v2200_v16, %v3848_v51 }
0x144d   :  { %v1365_v34 = vpop.permute.xlu1 %1364 }
0x1451   :  { %v2476_v33 = vpop.permute.xlu1 %2475 }
0x1452   :  { %v2478_v35 = vmul.f32 %v2476_v33, %v3826_v9 }
0x1454   :  { %v2479_v1 = vmul.f32 %v2478_v35, %v3848_v51 }
0x1455   :  { %v1645_v49 = vpop.permute.xlu1 %1644 }
0x1459   :  { %v2205_v52 = vpop.permute.xlu1 %2204 }
0x14b6   :  { %v819_v30 = vpop.xlane.xlu0 %818 }
0x14b7   :  { %v2470_v28 = vpop.f32.mrf.mxu0  ;;  %v820_v61 = vadd.f32 %v2535_v43, %v819_v30 }
0x14b8   :  { %v2471_v46 = vadd.f32 %v3816_v22, %v2470_v28  ;;  %v1361_v22 = vmul.f32 %v1360_v41, %v3848_v51 }
0x14b9   :  { %v3010_v38 = vpop.f32.mrf.mxu0 }
0x14ba   :  { %v2474_v12 = vmax.f32 %v2471_v46, 0.0  ;;  %v1918_v45 = vpop.permute.xlu0 %1917  ;;  %v1367_v10 = vadd.f32 %v1365_v34, %v1361_v22 }
0x14bb   :  { %v1920_v48 = vmul.f32 %v1918_v45, %v3694_v29  ;;  %v2207_v29 = vadd.f32 %v2205_v52, %v2201_v53 }
0x14bc   :  { %v2480_v40 = vmul.f32 %v3824_v32, %v2474_v12  ;;  %v1641_v32 = vmul.f32 %v1640_v47, %v3848_v51 }
0x14bd   :  { %v1921_v58 = vmul.f32 %v1920_v48, %v3848_v51 }
0x14be   :  { %2482 = vrot.lane.b32.xlu0 %v2480_v40, %s3099_s14  ;;  %v1647_v26 = vadd.f32 %v1645_v49, %v1641_v32  ;;  %v1925_v50 = vpop.permute.xlu0 %1924 }
0x14bf   :  { %v1927_v31 = vadd.f32 %v1925_v50, %v1921_v58 }
0x14c2   :  { %1089 = vrot.lane.b32.xlu0 %v1087_v44, %s3095_s25 }
0x14c6   :  { %1369 = vrot.lane.b32.xlu0 %v1367_v10, %s3095_s25 }
0x14ca   :  { %1649 = vrot.lane.b32.xlu0 %v1647_v26, %s3095_s25 }
0x14ce   :  { %1929 = vrot.lane.b32.xlu0 %v1927_v31, %s3095_s25 }
0x14d2   :  { %2209 = vrot.lane.b32.xlu0 %v2207_v29, %s3095_s25 }
0x1530   :  { %v2483_v2 = vpop.permute.xlu0 %2482 }
0x1531   :  { %v2485_v4 = vadd.f32 %v2483_v2, %v2479_v1 }
0x1533   :  { %2487 = vrot.lane.b32.xlu0 %v2485_v4, %s3095_s25 }
0x1534   :  { %v1090_v59 = vpop.permute.xlu0 %1089 }
0x1535   :  { %v1092_v36 = vsel %vm210_vm2, %v1090_v59, 0.0 }
0x1536   :  { %1093 = vadd.xlane.f32.xlu1 %v1092_v36 }
0x1538   :  { %v1370_v14 = vpop.permute.xlu0 %1369 }
0x1539   :  { %v1372_v9 = vsel %vm210_vm2, %v1370_v14, 0.0 }
0x153c   :  { %v1650_v17 = vpop.permute.xlu0 %1649 }
0x153d   :  { %v1652_v18 = vsel %vm210_vm2, %v1650_v17, 0.0 }
0x153e   :  { %1653 = vadd.xlane.f32.xlu1 %v1652_v18 }
0x1540   :  { %v1930_v62 = vpop.permute.xlu0 %1929 }
0x1541   :  { %v1932_v51 = vsel %vm210_vm2, %v1930_v62, 0.0 }
0x1544   :  { %v2210_v63 = vpop.permute.xlu0 %2209 }
0x1545   :  { %v2212_v0 = vsel %vm210_vm2, %v2210_v63, 0.0 }
0x154f   :  { %824 = vperm.xlu1 %3020, %v820_v61  }
0x1552   :  { %1373 = vadd.xlane.f32.xlu0 %v1372_v9 }
0x1556   :  { %1933 = vadd.xlane.f32.xlu0 %v1932_v51 }
0x155a   :  { %2213 = vadd.xlane.f32.xlu0 %v2212_v0 }
0x15a5   :  { %v2488_v24 = vpop.permute.xlu0 %2487 }
0x15a6   :  { %v2490_v54 = vsel %vm210_vm2, %v2488_v24, 0.0  ;;  %vm2507_vm2 = vcmask 64512  }
0x15a7   :  { %2491 = vadd.xlane.f32.xlu0 %v2490_v54 }
0x15bd   :  { %547 = vperm.xlu0 %3021, %v543_v23  }
0x15bf   :  { %v1094_v5 = vpop.xlane.xlu1 %1093 }
0x15c0   :  { %v1095_v6 = vadd.f32 %v2535_v43, %v1094_v5 }
0x15c2   :  { %1099 = vperm.xlu0 %3021, %v1095_v6  }
0x15c7   :  { %v1654_v3 = vpop.xlane.xlu1 %1653 }
0x15c8   :  { %v1655_v55 = vadd.f32 %v2535_v43, %v1654_v3 }
0x15ca   :  { %1659 = vperm.xlu0 %3021, %v1655_v55  }
0x15cb   :  { %v825_v25 = vpop.permute.xlu1 %824 }
0x15db   :  { %v1374_v39 = vpop.xlane.xlu0 %1373 }
0x15dc   :  { %v1375_v8 = vadd.f32 %v2535_v43, %v1374_v39 }
0x15de   :  { %1379 = vperm.xlu1 %3020, %v1375_v8  }
0x15df   :  { %v1934_v7 = vpop.xlane.xlu0 %1933 }
0x15e0   :  { %v1935_v56 = vadd.f32 %v2535_v43, %v1934_v7 }
0x15e2   :  { %1939 = vperm.xlu1 %3020, %v1935_v56  }
0x15e3   :  { %v2214_v13 = vpop.xlane.xlu0 %2213 }
0x15e4   :  { %v2215_v57 = vadd.f32 %v2535_v43, %v2214_v13 }
0x15e6   :  { %2219 = vperm.xlu0 %3021, %v2215_v57  }
0x1630   :  { %v2492_v60 = vpop.xlane.xlu0 %2491 }
0x1631   :  { %v2493_v21 = vadd.f32 %v2535_v43, %v2492_v60 }
0x1633   :  { %2497 = vperm.xlu0 %3021, %v2493_v21  }
0x1638   :  { %v548_v19 = vpop.permute.xlu0 %547 }
0x1639   :  { %v550_v27 = vsel %vm544_vm10, %v548_v19, 0.0 }
0x163a   :  { %v827_v34 = vsel %vm821_vm11, %v825_v25, %v550_v27 }
0x163d   :  { %v1100_v11 = vpop.permute.xlu0 %1099 }
0x163e   :  { %v1102_v38 = vsel %vm1096_vm12, %v1100_v11, %v827_v34 }
0x1645   :  { %v1660_v46 = vpop.permute.xlu0 %1659 }
0x1659   :  { %v1380_v28 = vpop.permute.xlu1 %1379 }
0x165a   :  { %v1382_v37 = vsel %vm1376_vm13, %v1380_v28, %v1102_v38 }
0x165b   :  { %v1662_v40 = vsel %vm1656_vm14, %v1660_v46, %v1382_v37 }
0x165d   :  { %v1940_v12 = vpop.permute.xlu1 %1939 }
0x165e   :  { %v1942_v41 = vsel %vm1936_vm15, %v1940_v12, %v1662_v40 }
0x1661   :  { %v2220_v30 = vpop.permute.xlu0 %2219 }
0x1662   :  { %v2222_v42 = vsel %vm2216_vm0, %v2220_v30, %v1942_v41 }
0x16ae   :  { %v2498_v33 = vpop.permute.xlu0 %2497 }
0x16af   :  { %v2500_v44 = vsel %vm2494_vm1, %v2498_v33, %v2222_v42 }
0x16b0   :  { %v2563_v45 = vmul.f32 -1.442695, %v2500_v44 }
0x16b2   :  { %3078 = vpow2.f32 %v2563_v45 }
0x16bf   :  { %v3079_v47 = vpop.eup %3078 }
0x16c0   :  { %v2504_v22 = vadd.f32 1.0, %v3079_v47 }
0x16c2   :  { %3080 = vrcp.f32 %v2504_v22 }
0x16cf   :  { %v3081_v10 = vpop.eup %3080 }
0x16d0   :  { %2508 = vst.msk [vmem:[%s3946_s13] sm:$0xff] %vm2507_vm2, %v3081_v10 }

</bundles_post_ra>
